<compile_context>
chip_gen: v6e
topology: v6e:2x2x1
jax: 0.10.0
libtpu: 0.0.40
codegen_flags: <defaults>
</compile_context>

<pallas_src>
import math
import functools

import jax
import jax.numpy as jnp
from jax.experimental import pallas as pl
from jax.experimental.pallas import tpu as pltpu


# Matmul operand dtype: bf16 operands, f32 accumulation (set to jnp.float32 for
# strict numerical parity with the PyTorch module at the cost of MXU throughput).
_MM_DTYPE = jnp.bfloat16


def _mm(x, w):
    """(B,S,Cin) @ (Cin,Cout) -> (B,S,Cout), f32 accumulation on the MXU."""
    return jnp.einsum('bse,ef->bsf', x.astype(_MM_DTYPE), w.astype(_MM_DTYPE),
                      preferred_element_type=jnp.float32)


def _layernorm(x, gamma, beta, eps=1e-5):
    # torch.nn.LayerNorm over the last dim (biased variance); gamma/beta are (1, E).
    mean = jnp.mean(x, axis=-1, keepdims=True)
    var = jnp.mean((x - mean) ** 2, axis=-1, keepdims=True)
    return (x - mean) * jax.lax.rsqrt(var + eps) * gamma + beta


# ----------------------------------------------------------------------------
# Fused decoder kernel: grid = (batch_tiles, num_layers)
# ----------------------------------------------------------------------------
def fused_decoder_kernel(
    x_ref, cond_ref, mask_ref,
    ln1_g_ref, ln1_b_ref,
    wred_x_ref, wred_c_ref, bred_ref,
    wqkv_ref, bqkv_ref, wo_ref, bo_ref,
    ln2_g_ref, ln2_b_ref,
    w1_ref, b1_ref, w2_ref, b2_ref,
    wf_ref, bf_ref,
    o_ref,
    x_scr,
    *, num_heads,
):
    layer = pl.program_id(1)
    n_layers = pl.num_programs(1)

    # ---- layer 0: seed the resident scratch with the RoPE'd embeddings (full-tile,
    #      aligned store; RoPE itself is applied in the wrapper) ----
    @pl.when(layer == 0)
    def _():
        x_scr[...] = x_ref[...].astype(jnp.float32)

    src = x_scr[...]                                  # (Bt, S, E) f32, resident
    cond = cond_ref[...].astype(jnp.float32)          # (Bt, S, C)
    mask = mask_ref[...].astype(jnp.float32)          # (S, S) additive mask

    # ---- post-norm conditioning + linear_reduce (split matmuls, no lane concat) ----
    n1 = _layernorm(src, ln1_g_ref[...], ln1_b_ref[...])
    reduced = _mm(n1, wred_x_ref[...]) + _mm(cond, wred_c_ref[...]) + bred_ref[...]

    # ---- multi-head self-attention: fused QKV projection ----
    qkv = _mm(reduced, wqkv_ref[...]) + bqkv_ref[...]          # (Bt, S, 3E) f32
    Bt, S, E = src.shape
    H = num_heads
    hd = E // H
    scale = 1.0 / math.sqrt(hd)

    q = qkv[:, :, :E]
    k = qkv[:, :, E:2 * E]
    v = qkv[:, :, 2 * E:]

    # Fold heads into the leading batch dim -> batched 3-D einsums for all heads.
    # TODO(synk): for long sequences (S >~ 512) replace the full SxS score tensor
    # with a KV-blocked online-softmax (flash-style) loop to bound VMEM.
    q_hb = jnp.concatenate([q[:, :, h * hd:(h + 1) * hd] for h in range(H)], axis=0)
    k_hb = jnp.concatenate([k[:, :, h * hd:(h + 1) * hd] for h in range(H)], axis=0)
    v_hb = jnp.concatenate([v[:, :, h * hd:(h + 1) * hd] for h in range(H)], axis=0)

    scores = jnp.einsum('nqd,nkd->nqk', q_hb.astype(_MM_DTYPE), k_hb.astype(_MM_DTYPE),
                        preferred_element_type=jnp.float32) * scale
    scores = scores + mask[None, :, :]
    scores = scores - jnp.max(scores, axis=-1, keepdims=True)
    p = jnp.exp(scores)
    p = p / jnp.sum(p, axis=-1, keepdims=True)                 # exact divide (parity)
    ctx = jnp.einsum('nqk,nkd->nqd', p.astype(_MM_DTYPE), v_hb.astype(_MM_DTYPE),
                     preferred_element_type=jnp.float32)       # (H*Bt, S, hd)

    attn = jnp.concatenate([ctx[h * Bt:(h + 1) * Bt] for h in range(H)], axis=-1)
    attn = _mm(attn, wo_ref[...]) + bo_ref[...]                # full-E contraction

    # ---- residual + post-norm feed-forward (dropout is identity in eval mode) ----
    res = attn + reduced
    n2 = _layernorm(res, ln2_g_ref[...], ln2_b_ref[...])
    h1 = jnp.maximum(_mm(n2, w1_ref[...]) + b1_ref[...], 0.0)
    ff = _mm(h1, w2_ref[...]) + b2_ref[...]
    out = ff + res
    x_scr[...] = out

    # ---- final logits projection (lane-padded), only on the last layer step ----
    @pl.when(layer == n_layers - 1)
    def _():
        o_ref[...] = (_mm(out, wf_ref[...]) + bf_ref[...]).astype(o_ref.dtype)


# ----------------------------------------------------------------------------
# VMEM budgeting helpers
# ----------------------------------------------------------------------------
def _vmem_limit_bytes():
    cap = 64 * 1024 * 1024          # conservative fallback (v7x per-TC VMEM)
    try:
        info = pltpu.get_tpu_info()
        cap = int(getattr(info, "vmem_capacity_bytes", cap) or cap)
    except Exception:
        pass
    return int(0.85 * cap)


def _pick_batch_tile(B, S, E, C, F, H, KVp, vmem_limit):
    """Largest divisor of B whose per-step VMEM footprint fits the budget."""
    def est(bt):
        act_row = 4 * bt * S
        # per-layer bf16 weights, double-buffered by the pipeline
        w_layer = 2 * ((E + C) * E + 3 * E * E + E * E + 2 * E * F)
        resident = (4 * bt * S * E                 # x_scr scratch
                    + 2 * act_row * (E + C)        # x, cond blocks (double-buffered)
                    + 2 * 4 * S * S                # mask
                    + 2 * (2 * E * KVp + 4 * KVp)  # final weight + bias
                    + 2 * act_row * KVp)           # resident output block
        temps = act_row * (3 * E + F + 6 * E) + 2 * 4 * bt * H * S * S
        return resident + 2 * w_layer + temps
    for bt in sorted({d for d in range(1, B + 1) if B % d == 0}, reverse=True):
        if est(bt) <= 0.6 * vmem_limit:
            return bt
    return 1


# ----------------------------------------------------------------------------
# Wrapper: one pallas_call for the whole decoder
# ----------------------------------------------------------------------------
def fused_decoder(x, cond, mask, params, cfg):
    B, S, E = x.shape
    C = cond.shape[-1]
    F = cfg['forward_expansion'] * E
    L = cfg['num_layers']
    H = cfg['num_heads']
    KVp = params['w_final_p'].shape[-1]          # lane-padded logits width

    vmem_limit = _vmem_limit_bytes()
    bt = _pick_batch_tile(B, S, E, C, F, H, KVp, vmem_limit)
    grid = (B // bt, L)

    def act_spec(feat):
        return pl.BlockSpec((bt, S, feat), lambda b, l: (b, 0, 0))

    def const2(shape):
        return pl.BlockSpec(shape, lambda b, l: (0, 0))

    def wspec(s1, s2):           # stacked per-layer weight: (L, s1, s2), indexed by l
        return pl.BlockSpec((None, s1, s2), lambda b, l: (l, 0, 0))

    in_specs = [
        act_spec(E),                              # x (RoPE'd embedded tokens)
        act_spec(C),                              # cond
        const2((S, S)),                           # additive attention mask
        wspec(1, E), wspec(1, E),                 # ln1 gamma/beta
        wspec(E, E), wspec(C, E), wspec(1, E),    # w_red_x, w_red_c, b_red
        wspec(E, 3 * E), wspec(1, 3 * E),         # fused QKV
        wspec(E, E), wspec(1, E),                 # out proj
        wspec(1, E), wspec(1, E),                 # ln2 gamma/beta
        wspec(E, F), wspec(1, F),                 # ffn1
        wspec(F, E), wspec(1, E),                 # ffn2
        const2((E, KVp)), const2((1, KVp)),       # final linear (padded)
    ]
    out_spec = pl.BlockSpec((bt, S, KVp), lambda b, l: (b, 0, 0))

    weight_args = (params['ln1_g'], params['ln1_b'],
                   params['w_red_x'], params['w_red_c'], params['b_red'],
                   params['w_qkv'], params['b_qkv'],
                   params['w_o'], params['b_o'],
                   params['ln2_g'], params['ln2_b'],
                   params['w_ff1'], params['b_ff1'],
                   params['w_ff2'], params['b_ff2'])
    const_args = (mask, params['w_final_p'], params['b_final_p'])
    args = (x, cond, mask) + weight_args + (params['w_final_p'], params['b_final_p'])

    # Advisory cost estimate for the XLA scheduler (weights re-fetched B//bt times).
    def _nbytes(a):
        return int(a.size) * jnp.dtype(a.dtype).itemsize
    flops_layer = 2 * B * S * ((E + C) * E + 3 * E * E + 2 * S * E + E * E + 2 * E * F)
    flops = L * flops_layer + 2 * B * S * E * KVp
    transcendentals = L * B * (H * S * S + 2 * S)
    bytes_accessed = ((B // bt) * sum(_nbytes(a) for a in weight_args + const_args)
                      + _nbytes(x) + _nbytes(cond) + 4 * B * S * KVp)

    return pl.pallas_call(
        functools.partial(fused_decoder_kernel, num_heads=H),
        out_shape=jax.ShapeDtypeStruct((B, S, KVp), jnp.float32),
        grid_spec=pltpu.PrefetchScalarGridSpec(
            num_scalar_prefetch=0,
            grid=grid,
            in_specs=in_specs,
            out_specs=out_spec,
            scratch_shapes=[pltpu.VMEM((bt, S, E), jnp.float32)],
        ),
        compiler_params=pltpu.CompilerParams(
            dimension_semantics=("parallel", "arbitrary"),
            vmem_limit_bytes=vmem_limit,
        ),
        cost_estimate=pl.CostEstimate(flops=int(flops),
                                      transcendentals=int(transcendentals),
                                      bytes_accessed=int(bytes_accessed)),
    )(*args)


# ----------------------------------------------------------------------------
# RoPE tables + application (matches RotaryPositionalEmbedding exactly)
# ----------------------------------------------------------------------------
def build_rope_tables(embed_size, seq_len):
    dim = embed_size // 2
    inv_freq = 1.0 / (10000.0 ** (jnp.arange(0.0, dim, 2.0) / dim))        # (E//4,)
    t = jnp.arange(seq_len, dtype=jnp.float32)[:, None]                    # (S, 1)
    freqs = t * inv_freq[None, :]                                          # (S, E//4)
    sinusoid = jnp.concatenate([jnp.sin(freqs), jnp.cos(freqs)], axis=-1)  # (S, E//2)
    sinusoid = jnp.repeat(sinusoid, 2, axis=1)                             # (S, E)
    sin_part = sinusoid[:, : embed_size // 2]                              # (S, E//2)
    cos_part = sinusoid[:, embed_size // 2:]                               # (S, E//2)
    return sin_part.astype(jnp.float32), cos_part.astype(jnp.float32)


def apply_rope(x):
    """Replicates the (non-standard) reference rotary forward elementwise."""
    B, S, E = x.shape
    sin_p, cos_p = build_rope_tables(E, S)
    xa, xb = x[:, :, :E // 2], x[:, :, E // 2:]
    x_sin = xa * sin_p[None] - xb * cos_p[None]
    x_cos = xa * cos_p[None] + xb * sin_p[None]
    return jnp.concatenate([x_sin, x_cos], axis=-1)


# ----------------------------------------------------------------------------
# Full decoder forward (embedding gather + RoPE in JAX glue, rest in Pallas)
# ----------------------------------------------------------------------------
def decoder_forward(src_tokens, cond, mask, params, cfg):
    """src_tokens: (B, S, num_codebooks) int32; cond: (B, S, cond_size); mask: (S, S)."""
    K = cfg['num_codebooks']
    V = cfg['vocab_size']
    E = cfg['embed_size']
    B, S, _ = src_tokens.shape

    # MultiEmbedding: per-codebook gather + concat (data-dependent gather kept in JAX glue).
    emb = params['emb_tables'][jnp.arange(K), src_tokens]        # (B, S, K, E//K)
    x = emb.reshape(B, S, E).astype(jnp.float32)

    # TODO(synk): nn.Dropout is identity in eval mode; not implemented as a kernel.
    x = apply_rope(x)

    # All transformer blocks + final projection: one fused Pallas kernel.
    logits_p = fused_decoder(x, cond, mask, params, cfg)         # (B, S, KVp)
    logits = logits_p[:, :, :K * V]                              # strip lane padding
    return logits.reshape(B, S, K, V)


# ----------------------------------------------------------------------------
# Deterministic parameter init + prep (stacked per-layer weights, (in, out) layout)
# ----------------------------------------------------------------------------
def init_params(key, cfg):
    E = cfg['embed_size']
    C = cfg['cond_size']
    F = cfg['forward_expansion'] * E
    K = cfg['num_codebooks']
    V = cfg['vocab_size']
    L = cfg['num_layers']
    per_tok = E // K

    keys = iter(jax.random.split(key, 64))

    def dense(shape, scale=0.05):
        return (scale * jax.random.normal(next(keys), shape)).astype(jnp.float32)

    return dict(
        emb_tables=dense((K, V, per_tok), 0.2),
        ln1_g=jnp.ones((L, 1, E), jnp.float32), ln1_b=jnp.zeros((L, 1, E), jnp.float32),
        w_red=dense((L, E + C, E)), b_red=dense((L, 1, E)),
        w_qkv=dense((L, E, 3 * E)), b_qkv=dense((L, 1, 3 * E)),
        w_o=dense((L, E, E)), b_o=dense((L, 1, E)),
        ln2_g=jnp.ones((L, 1, E), jnp.float32), ln2_b=jnp.zeros((L, 1, E), jnp.float32),
        w_ff1=dense((L, E, F)), b_ff1=dense((L, 1, F)),
        w_ff2=dense((L, F, E)), b_ff2=dense((L, 1, E)),
        w_final=dense((E, K * V)), b_final=dense((1, K * V)),
    )


def prepare_params(params, cfg):
    """One-time prep: bf16 weight storage, linear_reduce split, lane-padded logits head."""
    E = cfg['embed_size']
    KV = cfg['num_codebooks'] * cfg['vocab_size']
    KVp = ((KV + 127) // 128) * 128

    p = dict(params)
    p['w_red_x'] = params['w_red'][:, :E, :].astype(jnp.bfloat16)
    p['w_red_c'] = params['w_red'][:, E:, :].astype(jnp.bfloat16)
    for name in ('w_qkv', 'w_o', 'w_ff1', 'w_ff2'):
        p[name] = params[name].astype(jnp.bfloat16)
    p['w_final_p'] = jnp.pad(params['w_final'].astype(jnp.bfloat16),
                             ((0, 0), (0, KVp - KV)))
    p['b_final_p'] = jnp.pad(params['b_final'], ((0, 0), (0, KVp - KV)))
    for name in ('w_red', 'w_final', 'b_final'):
        p.pop(name)
    return p


# ----------------------------------------------------------------------------
# main
# ----------------------------------------------------------------------------
if __name__ == "__main__":
    cfg = dict(
        embed_size=32,
        num_layers=2,
        num_heads=4,
        forward_expansion=4,
        dropout=0.0,
        max_len=64,
        num_classes=16,
        num_codebooks=4,
        vocab_size=16,
        cond_size=8,
    )
    B, S = 2, 8

    key = jax.random.PRNGKey(0)
    k_tok, k_cond, k_par = jax.random.split(key, 3)

    src_tokens = jax.random.randint(
        k_tok, (B, S, cfg['num_codebooks']), 0, cfg['vocab_size'], dtype=jnp.int32)
    cond = jax.random.normal(k_cond, (B, S, cfg['cond_size']), dtype=jnp.float32)

    # causal additive attention mask (0 where attended, large negative where masked)
    causal = jnp.tril(jnp.ones((S, S), dtype=bool))
    mask = jnp.where(causal, 0.0, -1e9).astype(jnp.float32)

    params = prepare_params(init_params(k_par, cfg), cfg)

    fwd = jax.jit(lambda toks, cnd, msk, prm: decoder_forward(toks, cnd, msk, prm, cfg))
    logits = fwd(src_tokens, cond, mask, params)
    logits = jax.block_until_ready(logits)

    expected = (B, S, cfg['num_codebooks'], cfg['vocab_size'])
    assert logits.shape == expected, (logits.shape, expected)
    assert bool(jnp.all(jnp.isfinite(logits)))
    print("KERNEL_OK")
</pallas_src>

<mosaic_0001>
module attributes {stable_mosaic.version = 11 : i64} {
  func.func @fused_decoder_kernel(%arg0: i32, %arg1: i32, %arg2: memref<2x8x32xf32, #tpu.memory_space<vmem>>, %arg3: memref<2x8x8xf32, #tpu.memory_space<vmem>>, %arg4: memref<8x8xf32, #tpu.memory_space<vmem>>, %arg5: memref<1x1x32xf32, #tpu.memory_space<vmem>>, %arg6: memref<1x1x32xf32, #tpu.memory_space<vmem>>, %arg7: memref<1x32x32xbf16, #tpu.memory_space<vmem>>, %arg8: memref<1x8x32xbf16, #tpu.memory_space<vmem>>, %arg9: memref<1x1x32xf32, #tpu.memory_space<vmem>>, %arg10: memref<1x32x96xbf16, #tpu.memory_space<vmem>>, %arg11: memref<1x1x96xf32, #tpu.memory_space<vmem>>, %arg12: memref<1x32x32xbf16, #tpu.memory_space<vmem>>, %arg13: memref<1x1x32xf32, #tpu.memory_space<vmem>>, %arg14: memref<1x1x32xf32, #tpu.memory_space<vmem>>, %arg15: memref<1x1x32xf32, #tpu.memory_space<vmem>>, %arg16: memref<1x32x128xbf16, #tpu.memory_space<vmem>>, %arg17: memref<1x1x128xf32, #tpu.memory_space<vmem>>, %arg18: memref<1x128x32xbf16, #tpu.memory_space<vmem>>, %arg19: memref<1x1x32xf32, #tpu.memory_space<vmem>>, %arg20: memref<32x128xbf16, #tpu.memory_space<vmem>>, %arg21: memref<1x128xf32, #tpu.memory_space<vmem>>, %arg22: memref<2x8x128xf32, #tpu.memory_space<vmem>>, %arg23: memref<2x8x32xf32, #tpu.memory_space<vmem>>) attributes {dimension_semantics = [#tpu.dimension_semantics<parallel>, #tpu.dimension_semantics<arbitrary>], iteration_bounds = array<i64: 1, 2>, scalar_prefetch = 0 : i64, scratch_operands = 1 : i64, tpu.core_type = #tpu.core_type<tc>, window_params = [{transform_indices = @transform_0, window_bounds = array<i64: 2, 8, 32>}, {transform_indices = @transform_1, window_bounds = array<i64: 2, 8, 8>}, {pipeline_mode = #tpu.pipeline_mode<synchronous>, transform_indices = @transform_2, window_bounds = array<i64: 8, 8>}, {transform_indices = @transform_3, window_bounds = array<i64: 1, 1, 32>}, {transform_indices = @transform_4, window_bounds = array<i64: 1, 1, 32>}, {transform_indices = @transform_5, window_bounds = array<i64: 1, 32, 32>}, {transform_indices = @transform_6, window_bounds = array<i64: 1, 8, 32>}, {transform_indices = @transform_7, window_bounds = array<i64: 1, 1, 32>}, {transform_indices = @transform_8, window_bounds = array<i64: 1, 32, 96>}, {transform_indices = @transform_9, window_bounds = array<i64: 1, 1, 96>}, {transform_indices = @transform_10, window_bounds = array<i64: 1, 32, 32>}, {transform_indices = @transform_11, window_bounds = array<i64: 1, 1, 32>}, {transform_indices = @transform_12, window_bounds = array<i64: 1, 1, 32>}, {transform_indices = @transform_13, window_bounds = array<i64: 1, 1, 32>}, {transform_indices = @transform_14, window_bounds = array<i64: 1, 32, 128>}, {transform_indices = @transform_15, window_bounds = array<i64: 1, 1, 128>}, {transform_indices = @transform_16, window_bounds = array<i64: 1, 128, 32>}, {transform_indices = @transform_17, window_bounds = array<i64: 1, 1, 32>}, {pipeline_mode = #tpu.pipeline_mode<synchronous>, transform_indices = @transform_18, window_bounds = array<i64: 32, 128>}, {pipeline_mode = #tpu.pipeline_mode<synchronous>, transform_indices = @transform_19, window_bounds = array<i64: 1, 128>}, {transform_indices = @transform_20, window_bounds = array<i64: 2, 8, 128>}]} {
    %c0_i32 = arith.constant 0 : i32
    %0 = arith.cmpi eq, %arg1, %c0_i32 : i32
    %1 = arith.extui %0 : i1 to i32
    %c0_i32_0 = arith.constant 0 : i32
    %2 = arith.cmpi ne, %1, %c0_i32_0 : i32
    scf.if %2 {
      %c0_78 = arith.constant 0 : index
      %c0_79 = arith.constant 0 : index
      %c0_80 = arith.constant 0 : index
      %163 = vector.load %arg2[%c0_78, %c0_79, %c0_80] : memref<2x8x32xf32, #tpu.memory_space<vmem>>, vector<2x8x32xf32>
      %c0_81 = arith.constant 0 : index
      %c0_82 = arith.constant 0 : index
      %c0_83 = arith.constant 0 : index
      %164 = vector.load %arg23[%c0_81, %c0_82, %c0_83] : memref<2x8x32xf32, #tpu.memory_space<vmem>>, vector<2x8x32xf32>
      tpu.vector_store %arg23[%c0_81, %c0_82, %c0_83], %163 {strides = array<i32>} : memref<2x8x32xf32, #tpu.memory_space<vmem>>, vector<2x8x32xf32>,
    } else {
    }
    %c0 = arith.constant 0 : index
    %c0_1 = arith.constant 0 : index
    %c0_2 = arith.constant 0 : index
    %3 = vector.load %arg23[%c0, %c0_1, %c0_2] : memref<2x8x32xf32, #tpu.memory_space<vmem>>, vector<2x8x32xf32>
    %c0_3 = arith.constant 0 : index
    %c0_4 = arith.constant 0 : index
    %c0_5 = arith.constant 0 : index
    %4 = vector.load %arg3[%c0_3, %c0_4, %c0_5] : memref<2x8x8xf32, #tpu.memory_space<vmem>>, vector<2x8x8xf32>
    %c0_6 = arith.constant 0 : index
    %c0_7 = arith.constant 0 : index
    %5 = vector.load %arg4[%c0_6, %c0_7] : memref<8x8xf32, #tpu.memory_space<vmem>>, vector<8x8xf32>
    %c0_8 = arith.constant 0 : index
    %c0_9 = arith.constant 0 : index
    %c0_10 = arith.constant 0 : index
    %6 = vector.load %arg5[%c0_8, %c0_9, %c0_10] : memref<1x1x32xf32, #tpu.memory_space<vmem>>, vector<1x1x32xf32>
    %7 = vector.shape_cast %6 : vector<1x1x32xf32> to vector<1x32xf32>
    %c0_11 = arith.constant 0 : index
    %c0_12 = arith.constant 0 : index
    %c0_13 = arith.constant 0 : index
    %8 = vector.load %arg6[%c0_11, %c0_12, %c0_13] : memref<1x1x32xf32, #tpu.memory_space<vmem>>, vector<1x1x32xf32>
    %9 = vector.shape_cast %8 : vector<1x1x32xf32> to vector<1x32xf32>
    %cst = arith.constant dense<0.000000e+00> : vector<2x8xf32>
    %10 = vector.multi_reduction <add>, %3, %cst [2] : vector<2x8x32xf32> to vector<2x8xf32>
    %11 = vector.shape_cast %10 : vector<2x8xf32> to vector<2x8x1xf32>
    %cst_14 = arith.constant 3.200000e+01 : f32
    %12 = vector.broadcast %cst_14 : f32 to vector<2x8x1xf32>
    %13 = arith.divf %11, %12 : vector<2x8x1xf32>
    %14 = vector.broadcast %13 : vector<2x8x1xf32> to vector<2x8x32xf32>
    %15 = arith.subf %3, %14 : vector<2x8x32xf32>
    %16 = arith.mulf %15, %15 : vector<2x8x32xf32>
    %cst_15 = arith.constant dense<0.000000e+00> : vector<2x8xf32>
    %17 = vector.multi_reduction <add>, %16, %cst_15 [2] : vector<2x8x32xf32> to vector<2x8xf32>
    %18 = vector.shape_cast %17 : vector<2x8xf32> to vector<2x8x1xf32>
    %cst_16 = arith.constant 3.200000e+01 : f32
    %19 = vector.broadcast %cst_16 : f32 to vector<2x8x1xf32>
    %20 = arith.divf %18, %19 : vector<2x8x1xf32>
    %21 = vector.broadcast %13 : vector<2x8x1xf32> to vector<2x8x32xf32>
    %22 = arith.subf %3, %21 : vector<2x8x32xf32>
    %cst_17 = arith.constant 9.99999974E-6 : f32
    %23 = vector.broadcast %cst_17 : f32 to vector<2x8x1xf32>
    %24 = arith.addf %20, %23 : vector<2x8x1xf32>
    %25 = math.rsqrt %24 : vector<2x8x1xf32>
    %26 = vector.broadcast %25 : vector<2x8x1xf32> to vector<2x8x32xf32>
    %27 = arith.mulf %22, %26 : vector<2x8x32xf32>
    %28 = vector.shape_cast %7 : vector<1x32xf32> to vector<1x1x32xf32>
    %29 = vector.broadcast %28 : vector<1x1x32xf32> to vector<2x8x32xf32>
    %30 = arith.mulf %27, %29 : vector<2x8x32xf32>
    %31 = vector.shape_cast %9 : vector<1x32xf32> to vector<1x1x32xf32>
    %32 = vector.broadcast %31 : vector<1x1x32xf32> to vector<2x8x32xf32>
    %33 = arith.addf %30, %32 : vector<2x8x32xf32>
    %c0_18 = arith.constant 0 : index
    %c0_19 = arith.constant 0 : index
    %c0_20 = arith.constant 0 : index
    %34 = vector.load %arg7[%c0_18, %c0_19, %c0_20] : memref<1x32x32xbf16, #tpu.memory_space<vmem>>, vector<1x32x32xbf16>
    %35 = vector.shape_cast %34 : vector<1x32x32xbf16> to vector<32x32xbf16>
    %36 = arith.truncf %33 : vector<2x8x32xf32> to vector<2x8x32xbf16>
    "tpu.trace_start"() <{level = 10 : i32, message = "bse,ef->bsf"}> : () -> ()
    %cst_21 = arith.constant dense<0.000000e+00> : vector<2x8x32xf32>
    %37 = tpu.matmul %36, %35, %cst_21 {dimension_numbers = #tpu.dot_dimension_numbers<[2], [0], [0, 1], [1], [0, 0, 0, 1, 1, 1], [], []>} : vector<2x8x32xbf16>, vector<32x32xbf16>, vector<2x8x32xf32> -> vector<2x8x32xf32>
    "tpu.trace_stop"() : () -> ()
    %c0_22 = arith.constant 0 : index
    %c0_23 = arith.constant 0 : index
    %c0_24 = arith.constant 0 : index
    %38 = vector.load %arg8[%c0_22, %c0_23, %c0_24] : memref<1x8x32xbf16, #tpu.memory_space<vmem>>, vector<1x8x32xbf16>
    %39 = vector.shape_cast %38 : vector<1x8x32xbf16> to vector<8x32xbf16>
    %40 = arith.truncf %4 : vector<2x8x8xf32> to vector<2x8x8xbf16>
    "tpu.trace_start"() <{level = 10 : i32, message = "bse,ef->bsf"}> : () -> ()
    %cst_25 = arith.constant dense<0.000000e+00> : vector<2x8x32xf32>
    %41 = tpu.matmul %40, %39, %cst_25 {dimension_numbers = #tpu.dot_dimension_numbers<[2], [0], [0, 1], [1], [0, 0, 0, 1, 1, 1], [], []>} : vector<2x8x8xbf16>, vector<8x32xbf16>, vector<2x8x32xf32> -> vector<2x8x32xf32>
    "tpu.trace_stop"() : () -> ()
    %42 = arith.addf %37, %41 : vector<2x8x32xf32>
    %c0_26 = arith.constant 0 : index
    %c0_27 = arith.constant 0 : index
    %c0_28 = arith.constant 0 : index
    %43 = vector.load %arg9[%c0_26, %c0_27, %c0_28] : memref<1x1x32xf32, #tpu.memory_space<vmem>>, vector<1x1x32xf32>
    %44 = vector.shape_cast %43 : vector<1x1x32xf32> to vector<1x32xf32>
    %45 = vector.shape_cast %44 : vector<1x32xf32> to vector<1x1x32xf32>
    %46 = vector.broadcast %45 : vector<1x1x32xf32> to vector<2x8x32xf32>
    %47 = arith.addf %42, %46 : vector<2x8x32xf32>
    %c0_29 = arith.constant 0 : index
    %c0_30 = arith.constant 0 : index
    %c0_31 = arith.constant 0 : index
    %48 = vector.load %arg10[%c0_29, %c0_30, %c0_31] : memref<1x32x96xbf16, #tpu.memory_space<vmem>>, vector<1x32x96xbf16>
    %49 = vector.shape_cast %48 : vector<1x32x96xbf16> to vector<32x96xbf16>
    %50 = arith.truncf %47 : vector<2x8x32xf32> to vector<2x8x32xbf16>
    "tpu.trace_start"() <{level = 10 : i32, message = "bse,ef->bsf"}> : () -> ()
    %cst_32 = arith.constant dense<0.000000e+00> : vector<2x8x96xf32>
    %51 = tpu.matmul %50, %49, %cst_32 {dimension_numbers = #tpu.dot_dimension_numbers<[2], [0], [0, 1], [1], [0, 0, 0, 1, 1, 1], [], []>} : vector<2x8x32xbf16>, vector<32x96xbf16>, vector<2x8x96xf32> -> vector<2x8x96xf32>
    "tpu.trace_stop"() : () -> ()
    %c0_33 = arith.constant 0 : index
    %c0_34 = arith.constant 0 : index
    %c0_35 = arith.constant 0 : index
    %52 = vector.load %arg11[%c0_33, %c0_34, %c0_35] : memref<1x1x96xf32, #tpu.memory_space<vmem>>, vector<1x1x96xf32>
    %53 = vector.shape_cast %52 : vector<1x1x96xf32> to vector<1x96xf32>
    %54 = vector.shape_cast %53 : vector<1x96xf32> to vector<1x1x96xf32>
    %55 = vector.broadcast %54 : vector<1x1x96xf32> to vector<2x8x96xf32>
    %56 = arith.addf %51, %55 : vector<2x8x96xf32>
    %57 = vector.extract_strided_slice %56 {offsets = [0, 0, 0], sizes = [2, 8, 32], strides = [1, 1, 1]} : vector<2x8x96xf32> to vector<2x8x32xf32>
    %58 = vector.extract_strided_slice %56 {offsets = [0, 0, 32], sizes = [2, 8, 32], strides = [1, 1, 1]} : vector<2x8x96xf32> to vector<2x8x32xf32>
    %59 = vector.extract_strided_slice %56 {offsets = [0, 0, 64], sizes = [2, 8, 32], strides = [1, 1, 1]} : vector<2x8x96xf32> to vector<2x8x32xf32>
    %60 = vector.extract_strided_slice %57 {offsets = [0, 0, 0], sizes = [2, 8, 8], strides = [1, 1, 1]} : vector<2x8x32xf32> to vector<2x8x8xf32>
    %61 = vector.extract_strided_slice %57 {offsets = [0, 0, 8], sizes = [2, 8, 8], strides = [1, 1, 1]} : vector<2x8x32xf32> to vector<2x8x8xf32>
    %62 = vector.extract_strided_slice %57 {offsets = [0, 0, 16], sizes = [2, 8, 8], strides = [1, 1, 1]} : vector<2x8x32xf32> to vector<2x8x8xf32>
    %63 = vector.extract_strided_slice %57 {offsets = [0, 0, 24], sizes = [2, 8, 8], strides = [1, 1, 1]} : vector<2x8x32xf32> to vector<2x8x8xf32>
    %64 = tpu.concatenate %60, %61, %62, %63 in 0 : vector<2x8x8xf32>, vector<2x8x8xf32>, vector<2x8x8xf32>, vector<2x8x8xf32> -> vector<8x8x8xf32>
    %65 = vector.extract_strided_slice %58 {offsets = [0, 0, 0], sizes = [2, 8, 8], strides = [1, 1, 1]} : vector<2x8x32xf32> to vector<2x8x8xf32>
    %66 = vector.extract_strided_slice %58 {offsets = [0, 0, 8], sizes = [2, 8, 8], strides = [1, 1, 1]} : vector<2x8x32xf32> to vector<2x8x8xf32>
    %67 = vector.extract_strided_slice %58 {offsets = [0, 0, 16], sizes = [2, 8, 8], strides = [1, 1, 1]} : vector<2x8x32xf32> to vector<2x8x8xf32>
    %68 = vector.extract_strided_slice %58 {offsets = [0, 0, 24], sizes = [2, 8, 8], strides = [1, 1, 1]} : vector<2x8x32xf32> to vector<2x8x8xf32>
    %69 = tpu.concatenate %65, %66, %67, %68 in 0 : vector<2x8x8xf32>, vector<2x8x8xf32>, vector<2x8x8xf32>, vector<2x8x8xf32> -> vector<8x8x8xf32>
    %70 = vector.extract_strided_slice %59 {offsets = [0, 0, 0], sizes = [2, 8, 8], strides = [1, 1, 1]} : vector<2x8x32xf32> to vector<2x8x8xf32>
    %71 = vector.extract_strided_slice %59 {offsets = [0, 0, 8], sizes = [2, 8, 8], strides = [1, 1, 1]} : vector<2x8x32xf32> to vector<2x8x8xf32>
    %72 = vector.extract_strided_slice %59 {offsets = [0, 0, 16], sizes = [2, 8, 8], strides = [1, 1, 1]} : vector<2x8x32xf32> to vector<2x8x8xf32>
    %73 = vector.extract_strided_slice %59 {offsets = [0, 0, 24], sizes = [2, 8, 8], strides = [1, 1, 1]} : vector<2x8x32xf32> to vector<2x8x8xf32>
    %74 = tpu.concatenate %70, %71, %72, %73 in 0 : vector<2x8x8xf32>, vector<2x8x8xf32>, vector<2x8x8xf32>, vector<2x8x8xf32> -> vector<8x8x8xf32>
    %75 = arith.truncf %64 : vector<8x8x8xf32> to vector<8x8x8xbf16>
    %76 = arith.truncf %69 : vector<8x8x8xf32> to vector<8x8x8xbf16>
    "tpu.trace_start"() <{level = 10 : i32, message = "nqd,nkd->nqk"}> : () -> ()
    %cst_36 = arith.constant dense<0.000000e+00> : vector<8x8x8xf32>
    %77 = tpu.matmul %75, %76, %cst_36 {dimension_numbers = #tpu.dot_dimension_numbers<[2], [2], [1], [1], [0, 0, 0, 1, 1, 1], [0], [0]>} : vector<8x8x8xbf16>, vector<8x8x8xbf16>, vector<8x8x8xf32> -> vector<8x8x8xf32>
    "tpu.trace_stop"() : () -> ()
    %cst_37 = arith.constant 0.353553385 : f32
    %78 = vector.broadcast %cst_37 : f32 to vector<8x8x8xf32>
    %79 = arith.mulf %77, %78 : vector<8x8x8xf32>
    %80 = vector.shape_cast %5 : vector<8x8xf32> to vector<1x8x8xf32>
    %81 = vector.broadcast %80 : vector<1x8x8xf32> to vector<8x8x8xf32>
    %82 = arith.addf %79, %81 : vector<8x8x8xf32>
    %cst_38 = arith.constant dense<0xFF800000> : vector<8x8xf32>
    %83 = vector.multi_reduction <maximumf>, %82, %cst_38 [2] : vector<8x8x8xf32> to vector<8x8xf32>
    %84 = vector.shape_cast %83 : vector<8x8xf32> to vector<8x8x1xf32>
    %85 = vector.broadcast %84 : vector<8x8x1xf32> to vector<8x8x8xf32>
    %86 = arith.subf %82, %85 : vector<8x8x8xf32>
    %87 = math.exp %86 : vector<8x8x8xf32>
    %cst_39 = arith.constant dense<0.000000e+00> : vector<8x8xf32>
    %88 = vector.multi_reduction <add>, %87, %cst_39 [2] : vector<8x8x8xf32> to vector<8x8xf32>
    %89 = vector.shape_cast %88 : vector<8x8xf32> to vector<8x8x1xf32>
    %90 = vector.broadcast %89 : vector<8x8x1xf32> to vector<8x8x8xf32>
    %91 = arith.divf %87, %90 : vector<8x8x8xf32>
    %92 = arith.truncf %91 : vector<8x8x8xf32> to vector<8x8x8xbf16>
    %93 = arith.truncf %74 : vector<8x8x8xf32> to vector<8x8x8xbf16>
    "tpu.trace_start"() <{level = 10 : i32, message = "nqk,nkd->nqd"}> : () -> ()
    %cst_40 = arith.constant dense<0.000000e+00> : vector<8x8x8xf32>
    %94 = tpu.matmul %92, %93, %cst_40 {dimension_numbers = #tpu.dot_dimension_numbers<[2], [1], [1], [2], [0, 0, 0, 1, 1, 2], [0], [0]>} : vector<8x8x8xbf16>, vector<8x8x8xbf16>, vector<8x8x8xf32> -> vector<8x8x8xf32>
    "tpu.trace_stop"() : () -> ()
    %95 = vector.extract_strided_slice %94 {offsets = [0, 0, 0], sizes = [2, 8, 8], strides = [1, 1, 1]} : vector<8x8x8xf32> to vector<2x8x8xf32>
    %96 = vector.extract_strided_slice %94 {offsets = [2, 0, 0], sizes = [2, 8, 8], strides = [1, 1, 1]} : vector<8x8x8xf32> to vector<2x8x8xf32>
    %97 = vector.extract_strided_slice %94 {offsets = [4, 0, 0], sizes = [2, 8, 8], strides = [1, 1, 1]} : vector<8x8x8xf32> to vector<2x8x8xf32>
    %98 = vector.extract_strided_slice %94 {offsets = [6, 0, 0], sizes = [2, 8, 8], strides = [1, 1, 1]} : vector<8x8x8xf32> to vector<2x8x8xf32>
    %99 = tpu.concatenate %95, %96, %97, %98 in 2 : vector<2x8x8xf32>, vector<2x8x8xf32>, vector<2x8x8xf32>, vector<2x8x8xf32> -> vector<2x8x32xf32>
    %c0_41 = arith.constant 0 : index
    %c0_42 = arith.constant 0 : index
    %c0_43 = arith.constant 0 : index
    %100 = vector.load %arg12[%c0_41, %c0_42, %c0_43] : memref<1x32x32xbf16, #tpu.memory_space<vmem>>, vector<1x32x32xbf16>
    %101 = vector.shape_cast %100 : vector<1x32x32xbf16> to vector<32x32xbf16>
    %102 = arith.truncf %99 : vector<2x8x32xf32> to vector<2x8x32xbf16>
    "tpu.trace_start"() <{level = 10 : i32, message = "bse,ef->bsf"}> : () -> ()
    %cst_44 = arith.constant dense<0.000000e+00> : vector<2x8x32xf32>
    %103 = tpu.matmul %102, %101, %cst_44 {dimension_numbers = #tpu.dot_dimension_numbers<[2], [0], [0, 1], [1], [0, 0, 0, 1, 1, 1], [], []>} : vector<2x8x32xbf16>, vector<32x32xbf16>, vector<2x8x32xf32> -> vector<2x8x32xf32>
    "tpu.trace_stop"() : () -> ()
    %c0_45 = arith.constant 0 : index
    %c0_46 = arith.constant 0 : index
    %c0_47 = arith.constant 0 : index
    %104 = vector.load %arg13[%c0_45, %c0_46, %c0_47] : memref<1x1x32xf32, #tpu.memory_space<vmem>>, vector<1x1x32xf32>
    %105 = vector.shape_cast %104 : vector<1x1x32xf32> to vector<1x32xf32>
    %106 = vector.shape_cast %105 : vector<1x32xf32> to vector<1x1x32xf32>
    %107 = vector.broadcast %106 : vector<1x1x32xf32> to vector<2x8x32xf32>
    %108 = arith.addf %103, %107 : vector<2x8x32xf32>
    %109 = arith.addf %108, %47 : vector<2x8x32xf32>
    %c0_48 = arith.constant 0 : index
    %c0_49 = arith.constant 0 : index
    %c0_50 = arith.constant 0 : index
    %110 = vector.load %arg14[%c0_48, %c0_49, %c0_50] : memref<1x1x32xf32, #tpu.memory_space<vmem>>, vector<1x1x32xf32>
    %111 = vector.shape_cast %110 : vector<1x1x32xf32> to vector<1x32xf32>
    %c0_51 = arith.constant 0 : index
    %c0_52 = arith.constant 0 : index
    %c0_53 = arith.constant 0 : index
    %112 = vector.load %arg15[%c0_51, %c0_52, %c0_53] : memref<1x1x32xf32, #tpu.memory_space<vmem>>, vector<1x1x32xf32>
    %113 = vector.shape_cast %112 : vector<1x1x32xf32> to vector<1x32xf32>
    %cst_54 = arith.constant dense<0.000000e+00> : vector<2x8xf32>
    %114 = vector.multi_reduction <add>, %109, %cst_54 [2] : vector<2x8x32xf32> to vector<2x8xf32>
    %115 = vector.shape_cast %114 : vector<2x8xf32> to vector<2x8x1xf32>
    %cst_55 = arith.constant 3.200000e+01 : f32
    %116 = vector.broadcast %cst_55 : f32 to vector<2x8x1xf32>
    %117 = arith.divf %115, %116 : vector<2x8x1xf32>
    %118 = vector.broadcast %117 : vector<2x8x1xf32> to vector<2x8x32xf32>
    %119 = arith.subf %109, %118 : vector<2x8x32xf32>
    %120 = arith.mulf %119, %119 : vector<2x8x32xf32>
    %cst_56 = arith.constant dense<0.000000e+00> : vector<2x8xf32>
    %121 = vector.multi_reduction <add>, %120, %cst_56 [2] : vector<2x8x32xf32> to vector<2x8xf32>
    %122 = vector.shape_cast %121 : vector<2x8xf32> to vector<2x8x1xf32>
    %cst_57 = arith.constant 3.200000e+01 : f32
    %123 = vector.broadcast %cst_57 : f32 to vector<2x8x1xf32>
    %124 = arith.divf %122, %123 : vector<2x8x1xf32>
    %125 = vector.broadcast %117 : vector<2x8x1xf32> to vector<2x8x32xf32>
    %126 = arith.subf %109, %125 : vector<2x8x32xf32>
    %cst_58 = arith.constant 9.99999974E-6 : f32
    %127 = vector.broadcast %cst_58 : f32 to vector<2x8x1xf32>
    %128 = arith.addf %124, %127 : vector<2x8x1xf32>
    %129 = math.rsqrt %128 : vector<2x8x1xf32>
    %130 = vector.broadcast %129 : vector<2x8x1xf32> to vector<2x8x32xf32>
    %131 = arith.mulf %126, %130 : vector<2x8x32xf32>
    %132 = vector.shape_cast %111 : vector<1x32xf32> to vector<1x1x32xf32>
    %133 = vector.broadcast %132 : vector<1x1x32xf32> to vector<2x8x32xf32>
    %134 = arith.mulf %131, %133 : vector<2x8x32xf32>
    %135 = vector.shape_cast %113 : vector<1x32xf32> to vector<1x1x32xf32>
    %136 = vector.broadcast %135 : vector<1x1x32xf32> to vector<2x8x32xf32>
    %137 = arith.addf %134, %136 : vector<2x8x32xf32>
    %c0_59 = arith.constant 0 : index
    %c0_60 = arith.constant 0 : index
    %c0_61 = arith.constant 0 : index
    %138 = vector.load %arg16[%c0_59, %c0_60, %c0_61] : memref<1x32x128xbf16, #tpu.memory_space<vmem>>, vector<1x32x128xbf16>
    %139 = vector.shape_cast %138 : vector<1x32x128xbf16> to vector<32x128xbf16>
    %140 = arith.truncf %137 : vector<2x8x32xf32> to vector<2x8x32xbf16>
    "tpu.trace_start"() <{level = 10 : i32, message = "bse,ef->bsf"}> : () -> ()
    %cst_62 = arith.constant dense<0.000000e+00> : vector<2x8x128xf32>
    %141 = tpu.matmul %140, %139, %cst_62 {dimension_numbers = #tpu.dot_dimension_numbers<[2], [0], [0, 1], [1], [0, 0, 0, 1, 1, 1], [], []>} : vector<2x8x32xbf16>, vector<32x128xbf16>, vector<2x8x128xf32> -> vector<2x8x128xf32>
    "tpu.trace_stop"() : () -> ()
    %c0_63 = arith.constant 0 : index
    %c0_64 = arith.constant 0 : index
    %c0_65 = arith.constant 0 : index
    %142 = vector.load %arg17[%c0_63, %c0_64, %c0_65] : memref<1x1x128xf32, #tpu.memory_space<vmem>>, vector<1x1x128xf32>
    %143 = vector.shape_cast %142 : vector<1x1x128xf32> to vector<1x128xf32>
    %144 = vector.shape_cast %143 : vector<1x128xf32> to vector<1x1x128xf32>
    %145 = vector.broadcast %144 : vector<1x1x128xf32> to vector<2x8x128xf32>
    %146 = arith.addf %141, %145 : vector<2x8x128xf32>
    %cst_66 = arith.constant 0.000000e+00 : f32
    %147 = vector.broadcast %cst_66 : f32 to vector<2x8x128xf32>
    %148 = arith.maximumf %146, %147 : vector<2x8x128xf32>
    %c0_67 = arith.constant 0 : index
    %c0_68 = arith.constant 0 : index
    %c0_69 = arith.constant 0 : index
    %149 = vector.load %arg18[%c0_67, %c0_68, %c0_69] : memref<1x128x32xbf16, #tpu.memory_space<vmem>>, vector<1x128x32xbf16>
    %150 = vector.shape_cast %149 : vector<1x128x32xbf16> to vector<128x32xbf16>
    %151 = arith.truncf %148 : vector<2x8x128xf32> to vector<2x8x128xbf16>
    "tpu.trace_start"() <{level = 10 : i32, message = "bse,ef->bsf"}> : () -> ()
    %cst_70 = arith.constant dense<0.000000e+00> : vector<2x8x32xf32>
    %152 = tpu.matmul %151, %150, %cst_70 {dimension_numbers = #tpu.dot_dimension_numbers<[2], [0], [0, 1], [1], [0, 0, 0, 1, 1, 1], [], []>} : vector<2x8x128xbf16>, vector<128x32xbf16>, vector<2x8x32xf32> -> vector<2x8x32xf32>
    "tpu.trace_stop"() : () -> ()
    %c0_71 = arith.constant 0 : index
    %c0_72 = arith.constant 0 : index
    %c0_73 = arith.constant 0 : index
    %153 = vector.load %arg19[%c0_71, %c0_72, %c0_73] : memref<1x1x32xf32, #tpu.memory_space<vmem>>, vector<1x1x32xf32>
    %154 = vector.shape_cast %153 : vector<1x1x32xf32> to vector<1x32xf32>
    %155 = vector.shape_cast %154 : vector<1x32xf32> to vector<1x1x32xf32>
    %156 = vector.broadcast %155 : vector<1x1x32xf32> to vector<2x8x32xf32>
    %157 = arith.addf %152, %156 : vector<2x8x32xf32>
    %158 = arith.addf %157, %109 : vector<2x8x32xf32>
    %c0_74 = arith.constant 0 : index
    %c0_75 = arith.constant 0 : index
    %c0_76 = arith.constant 0 : index
    %159 = vector.load %arg23[%c0_74, %c0_75, %c0_76] : memref<2x8x32xf32, #tpu.memory_space<vmem>>, vector<2x8x32xf32>
    tpu.vector_store %arg23[%c0_74, %c0_75, %c0_76], %158 {strides = array<i32>} : memref<2x8x32xf32, #tpu.memory_space<vmem>>, vector<2x8x32xf32>,
    %c1_i32 = arith.constant 1 : i32
    %160 = arith.cmpi eq, %arg1, %c1_i32 : i32
    %161 = arith.extui %160 : i1 to i32
    %c0_i32_77 = arith.constant 0 : i32
    %162 = arith.cmpi ne, %161, %c0_i32_77 : i32
    scf.if %162 {
      %c0_78 = arith.constant 0 : index
      %c0_79 = arith.constant 0 : index
      %163 = vector.load %arg20[%c0_78, %c0_79] : memref<32x128xbf16, #tpu.memory_space<vmem>>, vector<32x128xbf16>
      %164 = arith.truncf %158 : vector<2x8x32xf32> to vector<2x8x32xbf16>
      "tpu.trace_start"() <{level = 10 : i32, message = "bse,ef->bsf"}> : () -> ()
      %cst_80 = arith.constant dense<0.000000e+00> : vector<2x8x128xf32>
      %165 = tpu.matmul %164, %163, %cst_80 {dimension_numbers = #tpu.dot_dimension_numbers<[2], [0], [0, 1], [1], [0, 0, 0, 1, 1, 1], [], []>} : vector<2x8x32xbf16>, vector<32x128xbf16>, vector<2x8x128xf32> -> vector<2x8x128xf32>
      "tpu.trace_stop"() : () -> ()
      %c0_81 = arith.constant 0 : index
      %c0_82 = arith.constant 0 : index
      %166 = vector.load %arg21[%c0_81, %c0_82] : memref<1x128xf32, #tpu.memory_space<vmem>>, vector<1x128xf32>
      %167 = vector.shape_cast %166 : vector<1x128xf32> to vector<1x1x128xf32>
      %168 = vector.broadcast %167 : vector<1x1x128xf32> to vector<2x8x128xf32>
      %169 = arith.addf %165, %168 : vector<2x8x128xf32>
      %c0_83 = arith.constant 0 : index
      %c0_84 = arith.constant 0 : index
      %c0_85 = arith.constant 0 : index
      %170 = vector.load %arg22[%c0_83, %c0_84, %c0_85] : memref<2x8x128xf32, #tpu.memory_space<vmem>>, vector<2x8x128xf32>
      tpu.vector_store %arg22[%c0_83, %c0_84, %c0_85], %169 {strides = array<i32>} : memref<2x8x128xf32, #tpu.memory_space<vmem>>, vector<2x8x128xf32>,
    } else {
    }
    return
  }
  func.func @transform_0(%arg0: i32, %arg1: i32) -> (i32, i32, i32) {
    %c0_i32 = arith.constant 0 : i32
    %c0_i32_0 = arith.constant 0 : i32
    %c0_i32_1 = arith.constant 0 : i32
    return %arg0, %c0_i32, %c0_i32_0 : i32, i32, i32
  }
  func.func @transform_1(%arg0: i32, %arg1: i32) -> (i32, i32, i32) {
    %c0_i32 = arith.constant 0 : i32
    %c0_i32_0 = arith.constant 0 : i32
    %c0_i32_1 = arith.constant 0 : i32
    return %arg0, %c0_i32, %c0_i32_0 : i32, i32, i32
  }
  func.func @transform_2(%arg0: i32, %arg1: i32) -> (i32, i32) {
    %c0_i32 = arith.constant 0 : i32
    %c0_i32_0 = arith.constant 0 : i32
    %c0_i32_1 = arith.constant 0 : i32
    return %c0_i32, %c0_i32_0 : i32, i32
  }
  func.func @transform_3(%arg0: i32, %arg1: i32) -> (i32, i32, i32) {
    %c0_i32 = arith.constant 0 : i32
    %c0_i32_0 = arith.constant 0 : i32
    %c0_i32_1 = arith.constant 0 : i32
    return %arg1, %c0_i32, %c0_i32_0 : i32, i32, i32
  }
  func.func @transform_4(%arg0: i32, %arg1: i32) -> (i32, i32, i32) {
    %c0_i32 = arith.constant 0 : i32
    %c0_i32_0 = arith.constant 0 : i32
    %c0_i32_1 = arith.constant 0 : i32
    return %arg1, %c0_i32, %c0_i32_0 : i32, i32, i32
  }
  func.func @transform_5(%arg0: i32, %arg1: i32) -> (i32, i32, i32) {
    %c0_i32 = arith.constant 0 : i32
    %c0_i32_0 = arith.constant 0 : i32
    %c0_i32_1 = arith.constant 0 : i32
    return %arg1, %c0_i32, %c0_i32_0 : i32, i32, i32
  }
  func.func @transform_6(%arg0: i32, %arg1: i32) -> (i32, i32, i32) {
    %c0_i32 = arith.constant 0 : i32
    %c0_i32_0 = arith.constant 0 : i32
    %c0_i32_1 = arith.constant 0 : i32
    return %arg1, %c0_i32, %c0_i32_0 : i32, i32, i32
  }
  func.func @transform_7(%arg0: i32, %arg1: i32) -> (i32, i32, i32) {
    %c0_i32 = arith.constant 0 : i32
    %c0_i32_0 = arith.constant 0 : i32
    %c0_i32_1 = arith.constant 0 : i32
    return %arg1, %c0_i32, %c0_i32_0 : i32, i32, i32
  }
  func.func @transform_8(%arg0: i32, %arg1: i32) -> (i32, i32, i32) {
    %c0_i32 = arith.constant 0 : i32
    %c0_i32_0 = arith.constant 0 : i32
    %c0_i32_1 = arith.constant 0 : i32
    return %arg1, %c0_i32, %c0_i32_0 : i32, i32, i32
  }
  func.func @transform_9(%arg0: i32, %arg1: i32) -> (i32, i32, i32) {
    %c0_i32 = arith.constant 0 : i32
    %c0_i32_0 = arith.constant 0 : i32
    %c0_i32_1 = arith.constant 0 : i32
    return %arg1, %c0_i32, %c0_i32_0 : i32, i32, i32
  }
  func.func @transform_10(%arg0: i32, %arg1: i32) -> (i32, i32, i32) {
    %c0_i32 = arith.constant 0 : i32
    %c0_i32_0 = arith.constant 0 : i32
    %c0_i32_1 = arith.constant 0 : i32
    return %arg1, %c0_i32, %c0_i32_0 : i32, i32, i32
  }
  func.func @transform_11(%arg0: i32, %arg1: i32) -> (i32, i32, i32) {
    %c0_i32 = arith.constant 0 : i32
    %c0_i32_0 = arith.constant 0 : i32
    %c0_i32_1 = arith.constant 0 : i32
    return %arg1, %c0_i32, %c0_i32_0 : i32, i32, i32
  }
  func.func @transform_12(%arg0: i32, %arg1: i32) -> (i32, i32, i32) {
    %c0_i32 = arith.constant 0 : i32
    %c0_i32_0 = arith.constant 0 : i32
    %c0_i32_1 = arith.constant 0 : i32
    return %arg1, %c0_i32, %c0_i32_0 : i32, i32, i32
  }
  func.func @transform_13(%arg0: i32, %arg1: i32) -> (i32, i32, i32) {
    %c0_i32 = arith.constant 0 : i32
    %c0_i32_0 = arith.constant 0 : i32
    %c0_i32_1 = arith.constant 0 : i32
    return %arg1, %c0_i32, %c0_i32_0 : i32, i32, i32
  }
  func.func @transform_14(%arg0: i32, %arg1: i32) -> (i32, i32, i32) {
    %c0_i32 = arith.constant 0 : i32
    %c0_i32_0 = arith.constant 0 : i32
    %c0_i32_1 = arith.constant 0 : i32
    return %arg1, %c0_i32, %c0_i32_0 : i32, i32, i32
  }
  func.func @transform_15(%arg0: i32, %arg1: i32) -> (i32, i32, i32) {
    %c0_i32 = arith.constant 0 : i32
    %c0_i32_0 = arith.constant 0 : i32
    %c0_i32_1 = arith.constant 0 : i32
    return %arg1, %c0_i32, %c0_i32_0 : i32, i32, i32
  }
  func.func @transform_16(%arg0: i32, %arg1: i32) -> (i32, i32, i32) {
    %c0_i32 = arith.constant 0 : i32
    %c0_i32_0 = arith.constant 0 : i32
    %c0_i32_1 = arith.constant 0 : i32
    return %arg1, %c0_i32, %c0_i32_0 : i32, i32, i32
  }
  func.func @transform_17(%arg0: i32, %arg1: i32) -> (i32, i32, i32) {
    %c0_i32 = arith.constant 0 : i32
    %c0_i32_0 = arith.constant 0 : i32
    %c0_i32_1 = arith.constant 0 : i32
    return %arg1, %c0_i32, %c0_i32_0 : i32, i32, i32
  }
  func.func @transform_18(%arg0: i32, %arg1: i32) -> (i32, i32) {
    %c0_i32 = arith.constant 0 : i32
    %c0_i32_0 = arith.constant 0 : i32
    %c0_i32_1 = arith.constant 0 : i32
    return %c0_i32, %c0_i32_0 : i32, i32
  }
  func.func @transform_19(%arg0: i32, %arg1: i32) -> (i32, i32) {
    %c0_i32 = arith.constant 0 : i32
    %c0_i32_0 = arith.constant 0 : i32
    %c0_i32_1 = arith.constant 0 : i32
    return %c0_i32, %c0_i32_0 : i32, i32
  }
  func.func @transform_20(%arg0: i32, %arg1: i32) -> (i32, i32, i32) {
    %c0_i32 = arith.constant 0 : i32
    %c0_i32_0 = arith.constant 0 : i32
    %c0_i32_1 = arith.constant 0 : i32
    return %arg0, %c0_i32, %c0_i32_0 : i32, i32, i32
  }
}

</mosaic_0001>

<bundles_post_ra>
// kernel: _lambda_.1
= control target key start
LH: loop header
LB: loop body
LE: loop exit
PB: predicated region body
PF: predicated region fallthrough
CT: control target
= control target key end

     0   :  { %s3338_s22 = smov 0   ;;  %s3340_s23 = smov 0   ;;  %s3777_s0 = inlined_call_operand.vmem [shape: f32[2,8,32], index: 0, kind: input, shape index: {}]   ;;  %s3778_s1 = inlined_call_operand.vmem [shape: f32[2,8,8], index: 1, kind: input, shape index: {}]   ;;  %s3779_s2 = inlined_call_operand.vmem [shape: f32[8,8], index: 2, kind: input, shape index: {}]   ;;  %s3780_s3 = inlined_call_operand.vmem [shape: f32[2,1,32], index: 3, kind: input, shape index: {}]   ;;  %s3781_s4 = inlined_call_operand.vmem [shape: f32[2,1,32], index: 4, kind: input, shape index: {}]   ;;  %s3782_s5 = inlined_call_operand.vmem [shape: bf16[2,32,32], index: 5, kind: input, shape index: {}]   ;;  %s3783_s6 = inlined_call_operand.vmem [shape: bf16[2,8,32], index: 6, kind: input, shape index: {}]   ;;  %s3784_s7 = inlined_call_operand.vmem [shape: f32[2,1,32], index: 7, kind: input, shape index: {}]   ;;  %s3785_s8 = inlined_call_operand.vmem [shape: bf16[2,32,96], index: 8, kind: input, shape index: {}]   ;;  %s3786_s9 = inlined_call_operand.vmem [shape: f32[2,1,96], index: 9, kind: input, shape index: {}]   ;;  %s3787_s10 = inlined_call_operand.vmem [shape: bf16[2,32,32], index: 10, kind: input, shape index: {}]   ;;  %s3788_s11 = inlined_call_operand.vmem [shape: f32[2,1,32], index: 11, kind: input, shape index: {}]   ;;  %s3789_s12 = inlined_call_operand.vmem [shape: f32[2,1,32], index: 12, kind: input, shape index: {}]   ;;  %s3790_s13 = inlined_call_operand.vmem [shape: f32[2,1,32], index: 13, kind: input, shape index: {}]   ;;  %s3791_s14 = inlined_call_operand.vmem [shape: bf16[2,32,128], index: 14, kind: input, shape index: {}]   ;;  %s3792_s15 = inlined_call_operand.vmem [shape: f32[2,1,128], index: 15, kind: input, shape index: {}]   ;;  %s3793_s16 = inlined_call_operand.vmem [shape: bf16[2,128,32], index: 16, kind: input, shape index: {}]   ;;  %s3794_s17 = inlined_call_operand.vmem [shape: f32[2,1,32], index: 17, kind: input, shape index: {}]   ;;  %s3795_s18 = inlined_call_operand.vmem [shape: bf16[32,128], index: 18, kind: input, shape index: {}]   ;;  %s3796_s19 = inlined_call_operand.vmem [shape: f32[1,128], index: 19, kind: input, shape index: {}]   ;;  %s3797_s20 = inlined_call_operand.vmem [shape: f32[2,8,128], index: 20, kind: output, shape index: {}]  }
   0x1   :  { %3805 = sst [smem:[#allocation7_spill]] %s3777_s0 }
   0x2   :  { %3806 = sst [smem:[#allocation8_spill]] %s3778_s1  ;;  %s3336_s1 = smov 0  }
   0x3   :  { %3807 = sst [smem:[#allocation9_spill]] %s3779_s2 }
   0x4   :  { %3808 = sst [smem:[#allocation10_spill]] %s3780_s3 }
   0x5   :  { %3809 = sst [smem:[#allocation11_spill]] %s3781_s4 }
   0x6   :  { %3810 = sst [smem:[#allocation12_spill]] %s3782_s5 }
   0x7   :  { %3811 = sst [smem:[#allocation13_spill]] %s3783_s6 }
   0x8   :  { %3812 = sst [smem:[#allocation14_spill]] %s3785_s8 }
   0x9   :  { %3813 = sst [smem:[#allocation15_spill]] %s3787_s10 }
   0xa   :  { %3814 = sst [smem:[#allocation16_spill]] %s3795_s18 }
   0xb   :  { %3815 = sst [smem:[#allocation17_spill]] %s3796_s19 }
   0xc   :  { %3816 = sst [smem:[#allocation18_spill]] %s3797_s20 }
   0xd LB: > { %3817 = sst [smem:[#allocation3_spill]] %s3213_s22  ;;  %s39_s24 = sadd.s32 1, %s3213_s22  ;;  %s3217_s23 = sphi %s3340_s23, %s30_s23   ;;  %s3213_s22 = sphi %s3338_s22, %s3844_s22   ;;  %s3209_s1 = sphi %s3336_s1, %s3843_s1  }
   0xe   : > { %3818 = sst [smem:[#allocation4_spill]] %s3217_s23  ;;  %p2764_p0 = scmp.ge.s32.totalorder %s3217_s23, 1 }
   0xf   : > { %p40_p1 = scmp.ge.s32.totalorder %s39_s24, 2  ;;  %p717_p2 = scmp.lt.s32.totalorder %s3217_s23, 3 }
  0x11   : > { %s3846_s24 = smov (%p40_p1, %s39_s24), 0  ;;  %p718_p3 = pnand %p2764_p0, %p717_p2 }
  0x12   : > { %3819 = sst [smem:[#allocation5_spill]] %s3846_s24 }
  0x13   : > { %721 = sbr.rel (%p718_p3) target bundleno = 3025 (0xbd1), region = 100 }
  0x18   : > { %p848_p4 = scmp.lt.s32.totalorder %s3209_s1, 1  ;;  %s3822_s5 = sld [smem:[#allocation12_spill]] }
  0x19   : > { %s3824_s6 = sld [smem:[#allocation13_spill]]  ;;  %p2776_p5 = scmp.ne.s32.totalorder %s3209_s1, 0 }
  0x1a   : > { %s3358_s2 = scalar_select %p848_p4, %s3209_s1, 1 }
  0x1b   : > { %s3825_s8 = sld [smem:[#allocation14_spill]] }
  0x1c   : > { %s2839_s0 = sshll.u32 %s3358_s2, 4  ;;  %s2767_s21 = sshll.u32 %s3358_s2, 2 }
  0x1d   : > { %s3826_s10 = sld [smem:[#allocation15_spill]]  ;;  %s884_s26 = scalar_lea.vmem %s3789_s12, %s3358_s2 }
  0x1e   : > { %s3373_s3 = scalar_lea.vmem %s3822_s5, %s2839_s0  ;;  %s3413_s29 = scalar_lea.vmem %s3791_s14, %s2839_s0 }
  0x1f   : > { %3823 = sst [smem:[#allocation6_spill]] %s3373_s3  ;;  %s3378_s20 = scalar_lea.vmem %s3824_s6, %s2767_s21 }
  0x20   : > { %s887_s6 = scalar_lea.vmem %s3790_s13, %s3358_s2  ;;  %s895_s24 = scalar_lea.vmem %s3792_s15, %s3358_s2 }
  0x21   : > { %s3387_s4 = scalar_lea.vmem %s3825_s8, %s2839_s0  ;;  %s903_s27 = scalar_lea.vmem %s3794_s17, %s3358_s2 }
  0x22   : > { %914 = sbr.rel (%p2776_p5) target bundleno = 42 (0x2a), region = 104  ;;  %s3827_s28 = sld [smem:[#allocation7_spill]] (!%p2776_p5) }
  0x23   : > { %s3396_s3 = scalar_lea.vmem %s3826_s10, %s2839_s0  ;;  %s2843_s10 = sshll.u32 %s3358_s2, 6 }
  0x24   : > { %s3423_s21 = scalar_lea.vmem %s3793_s16, %s2843_s10 }
  0x27   : > { %vm917_vm0 = vcmask 261120  }
  0x28   : > { %v915_v0 = vld [vmem:[%s3827_s28] sm:$0xff]  ;;  %v916_v1 = vld [vmem:[%s3827_s28 + $0x8] sm:$0xff] }
  0x29   : > { %918 = vst.msk [vmem:[#allocation2] sm:$0xff] %vm917_vm0, %v915_v0  ;;  %919 = vst.msk [vmem:[#allocation2 + $0x8] sm:$0xff] %vm917_vm0, %v916_v1 }
  0x2a PF: > { %vm927_vm1 = vcmask 261120   ;;  %v977_v16 = vld [vmem:[%s3378_s20] sm:$0xf]  ;;  %vm989_vm2 = vcmask 1043456   ;;  %s3828_s10 = sld [smem:[#allocation6_spill]]  ;;  %v3219_v17 = vmov 0.0   ;;  %s3835_s20 = scalar_lea.vmem %s3784_s7, %s3358_s2 }
  0x2b   : > { %2909 = vmatprep.subr.bf16.mxu0 %v3219_v17  ;;  %v991_v18 = vsel %vm989_vm2, %v977_v16, 0  ;;  %2943 = vmatprep.subr.bf16.mxu1 %v3219_v17  ;;  %s3829_s23 = sld [smem:[#allocation8_spill]]  ;;  %vm3220_vm3 = vmmov 0   ;;  %vm985_vm4 = vcmask 64512   ;;  %v3139_v45 = vld [vmem:[%s3387_s4 + $0x8] sm:$0xff]   ;;  %v3140_v46 = vld [vmem:[%s3387_s4] sm:$0xff]  }
  0x2c   : > { %2910 = vmatpush3.bf16.msra.mxu0 %v991_v18  ;;  %2911 = vmatprep.mubr.msk.bf16.mxu0 %vm3220_vm3, %v3219_v17  ;;  %s3831_s30 = sld [smem:[#allocation10_spill]]  ;;  %v2785_v50 = vld [vmem:[%s3835_s20] ss:$0 sm:$0xff]  ;;  %s3223_s25 = smov 104   ;;  %vm2120_vm5 = vcmask 130048   ;;  %vm2123_vm6 = vcmask 195584  }
  0x2d   : > { %2915 = vmatprep.subr.bf16.mxu0 %v3219_v17  ;;  %2945 = vmatprep.mubr.msk.bf16.mxu1 %vm3220_vm3, %v3219_v17  ;;  %s3833_s22 = sld [smem:[#allocation11_spill]]  ;;  %s3226_s4 = smov 8  }
  0x2e   : > { %s3837_s20 = sld [smem:[#allocation9_spill]]  ;;  %s3227_s0 = smov 16  }
  0x2f   : > { %p2829_p6 = scmp.ne.s32.totalorder %s3209_s1, 1 }
  0x30   : > { %v920_v2 = vld [vmem:[#allocation2] sm:$0xff]  ;;  %v921_v3 = vld [vmem:[#allocation2 + $0x8] sm:$0xff] }
  0x31   : > { %v928_v4 = vsel %vm927_vm1, %v920_v2, 0.0  ;;  %v931_v5 = vsel %vm927_vm1, %v921_v3, 0.0  ;;  %s3830_s18 = smov %s3829_s23  ;;  %v922_v19 = vld [vmem:[%s3829_s23] sm:$0xff]  ;;  %v3137_v22 = vld [vmem:[%s3828_s10 + $0x8] sm:$0xff]  }
  0x32   : > { %929 = vadd.xlane.f32.xlu0 %v928_v4  ;;  %v923_v20 = vld [vmem:[%s3830_s18 + $0x8] sm:$0xff]  ;;  %v3138_v23 = vld [vmem:[%s3828_s10] sm:$0xff]   ;;  %s3832_s5 = scalar_lea.vmem %s3831_s30, %s3358_s2  ;;  %s3836_s30 = scalar_lea.vmem %s3786_s9, %s3358_s2 }
  0x33   : > { %v2844_v21 = vpack.c.bf16 %v923_v20, %v922_v19  ;;  %v2777_v32 = vld [vmem:[%s3832_s5] ss:$0 sm:$0xff]  ;;  %s3834_s23 = scalar_lea.vmem %s3833_s22, %s3358_s2  ;;  %s3221_s5 = smov 112  }
  0x34   : > { %v2778_v36 = vld [vmem:[%s3834_s23] ss:$0 sm:$0xff]  ;;  %s3222_s10 = smov 120   ;;  %s3224_s22 = smov 96  }
  0x35   : > { %2912 = vmatmul.mubr.msk.bf16.vlgmr.msra.gmra.mxu0 %vm985_vm4, %v2844_v21  ;;  %v2786_v58 = vld [vmem:[%s3836_s30] ss:$0 sm:$0xff]  ;;  %s3225_s23 = smov 64   ;;  %s3228_s30 = smov 24  }
  0x36   : > { %932 = vadd.xlane.f32.xlu0 %v931_v5  ;;  %2919 = vmatprep.mubr.msk.bf16.mxu0 %vm3220_vm3, %v3219_v17 }
  0x37   : > { %2916 = vmatpush3.bf16.msra.mxu0 %v3137_v22 }
  0x38   : > { %2917 = vmatprep.subr.bf16.mxu0 %v3219_v17 }
  0x3b   : > { %2918 = vmatpush3.bf16.msra.mxu0 %v3138_v23 }
  0x3c   : > { %2923 = vmatprep.subr.bf16.mxu0 %v3219_v17 }
  0xbb   : > { %v930_v6 = vpop.xlane.xlu0 %929 }
  0xbc   : > { %v935_v7 = vmul.f32 0.03125, %v930_v6 }
  0xbe   : > { %v937_v8 = vsub.f32 %v920_v2, %v935_v7 }
  0xbf   : > { %v933_v9 = vpop.xlane.xlu0 %932 }
  0xc0   : > { %v936_v10 = vmul.f32 0.03125, %v933_v9  ;;  %v939_v11 = vmul.f32 %v937_v8, %v937_v8 }
  0xc2   : > { %v938_v12 = vsub.f32 %v921_v3, %v936_v10  ;;  %v941_v13 = vsel %vm927_vm1, %v939_v11, 0.0 }
  0xc3   : > { %942 = vadd.xlane.f32.xlu1 %v941_v13 }
  0xc4   : > { %v940_v14 = vmul.f32 %v938_v12, %v938_v12 }
  0xc6   : > { %v944_v15 = vsel %vm927_vm1, %v940_v14, 0.0 }
  0xc7   : > { %945 = vadd.xlane.f32.xlu1 %v944_v15 }
  0xf5   : > { %v1027_v41 = vpop.f32.mrf.mxu0 }
  0xf7   : > { %v2913_v42 = vpop.f32.mrf.mxu0 }
  0xf9   : > { %v1030_v43 = vpop.f32.mrf.mxu0 }
  0xfb   : > { %v2914_v44 = vpop.f32.mrf.mxu0 }
 0x14c   : > { %v943_v24 = vpop.xlane.xlu1 %942 }
 0x14d   : > { %v947_v25 = vmul.f32 0.03125, %v943_v24 }
 0x14f   : > { %v949_v26 = vadd.f32 1e-05, %v947_v25 }
 0x150   : > { %v946_v27 = vpop.xlane.xlu1 %945 }
 0x151   : > { %3153 = vrsqrt.f32 %v949_v26  ;;  %v948_v28 = vmul.f32 0.03125, %v946_v27 }
 0x153   : > { %v950_v29 = vadd.f32 1e-05, %v948_v28 }
 0x155   : > { %3155 = vrsqrt.f32 %v950_v29 }
 0x15e   : > { %v3154_v30 = vpop.eup %3153 }
 0x15f   : > { %v953_v31 = vmul.f32 %v3154_v30, %v937_v8 }
 0x161   : > { %v961_v35 = vmul.f32 %v2777_v32, %v953_v31 }
 0x162   : > { %v3156_v33 = vpop.eup %3155 }
 0x163   : > { %v954_v34 = vmul.f32 %v3156_v33, %v938_v12  ;;  %v969_v38 = vadd.f32 %v2778_v36, %v961_v35 }
 0x165   : > { %v962_v37 = vmul.f32 %v2777_v32, %v954_v34 }
 0x167   : > { %v970_v39 = vadd.f32 %v2778_v36, %v962_v37 }
 0x169   : > { %v2845_v40 = vpack.c.bf16 %v970_v39, %v969_v38  ;;  %v924_v38 = vld [vmem:[%s3837_s20] sm:$0xff] }
 0x16b   : > { %2920 = vmatmul.mubr.msk.bf16.vlgmr.msra.gmra.mxu0 %vm927_vm1, %v2845_v40 }
 0x16c   : > { %2927 = vmatprep.mubr.msk.bf16.mxu0 %vm3220_vm3, %v3219_v17  ;;  %2924 = vmatpush3.bf16.msra.mxu0 %v3139_v45 }
 0x16d   : > { %2925 = vmatprep.subr.bf16.mxu0 %v3219_v17 }
 0x170   : > { %2926 = vmatpush3.bf16.msra.mxu0 %v3140_v46 }
 0x171   : > { %2931 = vmatprep.subr.bf16.mxu0 %v3219_v17 }
 0x22b   : > { %v1088_v47 = vpop.f32.mrf.mxu0 }
 0x22c   : > { %v1089_v49 = vadd.f32 %v1088_v47, %v1027_v41 }
 0x22d   : > { %v2921_v48 = vpop.f32.mrf.mxu0 }
 0x22e   : > { %v3484_v54 = vadd.f32 %v2785_v50, %v1089_v49 }
 0x22f   : > { %v1091_v51 = vpop.f32.mrf.mxu0 }
 0x230   : > { %v1092_v52 = vadd.f32 %v1091_v51, %v1030_v43 }
 0x231   : > { %v2922_v53 = vpop.f32.mrf.mxu0 }
 0x232   : > { %v3486_v55 = vadd.f32 %v2785_v50, %v1092_v52 }
 0x234   : > { %v2846_v56 = vpack.c.bf16 %v3486_v55, %v3484_v54 }
 0x236   : > { %2928 = vmatmul.mubr.msk.bf16.vlgmr.msra.gmra.mxu0 %vm927_vm1, %v2846_v56 }
 0x237   : > { %2933 = vmatprep.mubr.msk.bf16.mxu0 %vm3220_vm3, %v3219_v17 }
 0x2f6   : > { %v1171_v57 = vpop.f32.mrf.mxu0 }
 0x2f7   : > { %v1172_v61 = vadd.f32 %v2786_v58, %v1171_v57 }
 0x2f8   : > { %v2929_v59 = vpop.f32.mrf.mxu0 }
 0x2f9   : > { %v1198_v2 = vpack.c.bf16 %v1172_v61, %v1172_v61 }
 0x2fa   : > { %v1174_v60 = vpop.f32.mrf.mxu0 }
 0x2fb   : > { %v1175_v62 = vadd.f32 %v2786_v58, %v1174_v60 }
 0x2fc   : > { %v2930_v63 = vpop.f32.mrf.mxu0 }
 0x2fd   : > { %v3112_v0 = vpack.i.bf16 %v1175_v62, %v1172_v61  ;;  %v3498_v1 = vpack.c.bf16 %v1175_v62, %v1175_v62 }
 0x2ff   : > { %3113 = vrot.lane.b32.xlu1 %v3112_v0, %s3221_s5  ;;  %3108 = vrot.lane.b32.xlu0 %v3112_v0, %s3222_s10  ;;  %s3838_s10 = scalar_lea.vmem %s3788_s11, %s3358_s2  ;;  %s3841_s5 = sld [smem:[#allocation18_spill]] (!%p2829_p6) }
 0x303   : > { %3118 = vrot.lane.b32.xlu1 %v3112_v0, %s3223_s25  ;;  %1256 = vrot.lane.b32.xlu0 %v3498_v1, %s3224_s22 }
 0x307   : > { %1207 = vrot.lane.b32.xlu1 %v1198_v2, %s3224_s22 }
 0x371   : > { %v3114_v3 = vpop.permute.xlu1 %3113  ;;  %v3109_v4 = vpop.permute.xlu0 %3108 }
 0x372   : > { %v3111_v5 = vunpack.i.h.bf16 %v3109_v4  ;;  %v3110_v6 = vunpack.i.l.bf16 %v3109_v4  ;;  %v3116_v7 = vunpack.i.h.bf16 %v3114_v3  ;;  %v3115_v8 = vunpack.i.l.bf16 %v3114_v3 }
 0x374   : > { %v3501_v9 = vpack.c.bf16 %v3111_v5, %v3111_v5  ;;  %v3503_v10 = vpack.c.bf16 %v3110_v6, %v3110_v6  ;;  %v3507_v12 = vpack.c.bf16 %v3116_v7, %v3116_v7  ;;  %v3509_v13 = vpack.c.bf16 %v3115_v8, %v3115_v8 }
 0x375   : > { %v3119_v11 = vpop.permute.xlu1 %3118  ;;  %v1257_v21 = vpop.permute.xlu0 %1256 }
 0x376   : > { %1305 = vrot.lane.b32.xlu1 %v3503_v10, %s3224_s22  ;;  %1354 = vrot.lane.b32.xlu0 %v3501_v9, %s3224_s22  ;;  %v3121_v14 = vunpack.i.h.bf16 %v3119_v11  ;;  %v3120_v15 = vunpack.i.l.bf16 %v3119_v11  ;;  %v1262_v22 = vsel %vm985_vm4, %v1257_v21, 0 }
 0x378   : > { %v3514_v19 = vpack.c.bf16 %v3121_v14, %v3121_v14  ;;  %v3516_v20 = vpack.c.bf16 %v3120_v15, %v3120_v15 }
 0x379   : > { %v1208_v16 = vpop.permute.xlu1 %1207 }
 0x37a   : > { %v1213_v18 = vsel %vm985_vm4, %v1208_v16, 0  ;;  %1403 = vrot.lane.b32.xlu1 %v3509_v13, %s3224_s22  ;;  %1452 = vrot.lane.b32.xlu0 %v3507_v12, %s3224_s22 }
 0x37b   : > { %2932 = vmatpush3.bf16.xpose.msra.mxu0 %v1213_v18 }
 0x37c   : > { %2937 = vmatprep.subr.bf16.mxu0 %v3219_v17 }
 0x37e   : > { %1501 = vrot.lane.b32.xlu1 %v3516_v20, %s3224_s22  ;;  %1550 = vrot.lane.b32.xlu0 %v3514_v19, %s3224_s22 }
 0x382   : > { %2934 = vmatmul.mubr.msk.bf16.vlgmr.msra.gmra.mxu0 %vm985_vm4, %v1198_v2  ;;  %1710 = vrot.lane.b32.xlu1 %v1198_v2, %s3225_s23 }
 0x383   : > { %2938 = vmatpush3.bf16.xpose.msra.mxu0 %v1262_v22  ;;  %2939 = vmatprep.mubr.msk.bf16.mxu0 %vm3220_vm3, %v3219_v17 }
 0x384   : > { %2949 = vmatprep.subr.bf16.mxu0 %v3219_v17 }
 0x38a   : > { %2940 = vmatmul.mubr.msk.bf16.vlgmr.msra.gmra.mxu0 %vm985_vm4, %v3498_v1 }
 0x38b   : > { %2951 = vmatprep.mubr.msk.bf16.mxu0 %vm3220_vm3, %v3219_v17 }
 0x3e8   : > { %v1306_v23 = vpop.permute.xlu1 %1305  ;;  %v1355_v24 = vpop.permute.xlu0 %1354 }
 0x3e9   : > { %v1360_v25 = vsel %vm985_vm4, %v1355_v24, 0  ;;  %v1311_v26 = vsel %vm985_vm4, %v1306_v23, 0 }
 0x3ea   : > { %2944 = vmatpush3.bf16.xpose.msra.mxu1 %v1311_v26  ;;  %2950 = vmatpush3.bf16.xpose.msra.mxu0 %v1360_v25 }
 0x3eb   : > { %2955 = vmatprep.subr.bf16.mxu1 %v3219_v17  ;;  %2961 = vmatprep.subr.bf16.mxu0 %v3219_v17 }
 0x3ec   : > { %v1404_v27 = vpop.permute.xlu1 %1403  ;;  %v1453_v28 = vpop.permute.xlu0 %1452 }
 0x3ed   : > { %v1409_v29 = vsel %vm985_vm4, %v1404_v27, 0  ;;  %v1458_v30 = vsel %vm985_vm4, %v1453_v28, 0 }
 0x3f0   : > { %v1502_v31 = vpop.permute.xlu1 %1501  ;;  %v1551_v32 = vpop.permute.xlu0 %1550 }
 0x3f1   : > { %2946 = vmatmul.mubr.msk.bf16.vlgmr.msra.gmra.mxu1 %vm985_vm4, %v3503_v10  ;;  %2952 = vmatmul.mubr.msk.bf16.vlgmr.msra.gmra.mxu0 %vm985_vm4, %v3501_v9  ;;  %v1507_v33 = vsel %vm985_vm4, %v1502_v31, 0  ;;  %v1556_v34 = vsel %vm985_vm4, %v1551_v32, 0 }
 0x3f2   : > { %2956 = vmatpush3.bf16.xpose.msra.mxu1 %v1409_v29  ;;  %2962 = vmatpush3.bf16.xpose.msra.mxu0 %v1458_v30 }
 0x3f3   : > { %2957 = vmatprep.mubr.msk.bf16.mxu1 %vm3220_vm3, %v3219_v17  ;;  %2963 = vmatprep.mubr.msk.bf16.mxu0 %vm3220_vm3, %v3219_v17 }
 0x3f4   : > { %2967 = vmatprep.subr.bf16.mxu1 %v3219_v17  ;;  %2973 = vmatprep.subr.bf16.mxu0 %v3219_v17  ;;  %v1711_v35 = vpop.permute.xlu1 %1710 }
 0x3f5   : > { %v1716_v36 = vsel %vm989_vm2, %v1711_v35, 0 }
 0x3f9   : > { %2958 = vmatmul.mubr.msk.bf16.vlgmr.msra.gmra.mxu1 %vm985_vm4, %v3509_v13  ;;  %2964 = vmatmul.mubr.msk.bf16.vlgmr.msra.gmra.mxu0 %vm985_vm4, %v3507_v12 }
 0x3fa   : > { %2968 = vmatpush3.bf16.xpose.msra.mxu1 %v1507_v33  ;;  %2974 = vmatpush3.bf16.xpose.msra.mxu0 %v1556_v34 }
 0x3fb   : > { %2969 = vmatprep.mubr.msk.bf16.mxu1 %vm3220_vm3, %v3219_v17  ;;  %2975 = vmatprep.mubr.msk.bf16.mxu0 %vm3220_vm3, %v3219_v17 }
 0x3fc   : > { %2979 = vmatprep.subr.bf16.mxu1 %v3219_v17  ;;  %2985 = vmatprep.subr.bf16.mxu0 %v3219_v17 }
 0x401   : > { %2970 = vmatmul.mubr.msk.bf16.vlgmr.msra.gmra.mxu1 %vm985_vm4, %v3516_v20  ;;  %2976 = vmatmul.mubr.msk.bf16.vlgmr.msra.gmra.mxu0 %vm985_vm4, %v3514_v19 }
 0x402   : > { %2980 = vmatpush3.bf16.msra.mxu1 %v1716_v36  ;;  %2987 = vmatprep.mubr.msk.bf16.mxu0 %vm3220_vm3, %v3219_v17 }
 0x403   : > { %2981 = vmatprep.mubr.msk.bf16.mxu1 %vm3220_vm3, %v3219_v17  ;;  %2991 = vmatprep.subr.bf16.mxu1 %v3219_v17 }
 0x442   : > { %v1249_v37 = vpop.f32.mrf.mxu0 }
 0x443   : > { %v1598_v39 = vmul.f32 0.35355338, %v1249_v37 }
 0x444   : > { %v2935_v40 = vpop.f32.mrf.mxu0 }
 0x445   : > { %v3572_v41 = vadd.f32 %v1598_v39, %v924_v38 }
 0x446   : > { %v1252_v42 = vpop.f32.mrf.mxu0 }
 0x447   : > { %v1614_v43 = vsel %vm985_vm4, %v3572_v41, -inf }
 0x448   : > { %1615 = vmax.xlane.f32.xlu1 %v1614_v43  ;;  %v2936_v44 = vpop.f32.mrf.mxu0 }
 0x44a   : > { %v1298_v45 = vpop.f32.mrf.mxu0 }
 0x44b   : > { %v1599_v46 = vmul.f32 0.35355338, %v1298_v45 }
 0x44c   : > { %v2941_v47 = vpop.f32.mrf.mxu0 }
 0x44d   : > { %v1607_v48 = vadd.f32 %v1599_v46, %v924_v38 }
 0x44e   : > { %v1301_v49 = vpop.f32.mrf.mxu0 }
 0x44f   : > { %v1617_v50 = vsel %vm985_vm4, %v1607_v48, -inf }
 0x450   : > { %1618 = vmax.xlane.f32.xlu0 %v1617_v50  ;;  %v2942_v51 = vpop.f32.mrf.mxu0 }
 0x4b1   : > { %v1347_v52 = vpop.f32.mrf.mxu1  ;;  %v1396_v53 = vpop.f32.mrf.mxu0 }
 0x4b2   : > { %v1600_v56 = vmul.f32 0.35355338, %v1347_v52  ;;  %v1601_v57 = vmul.f32 0.35355338, %v1396_v53 }
 0x4b3   : > { %v2947_v58 = vpop.f32.mrf.mxu1  ;;  %v2953_v59 = vpop.f32.mrf.mxu0 }
 0x4b4   : > { %v1608_v60 = vadd.f32 %v1600_v56, %v924_v38  ;;  %v1609_v0 = vadd.f32 %v1601_v57, %v924_v38 }
 0x4b5   : > { %v1350_v61 = vpop.f32.mrf.mxu1  ;;  %v1399_v62 = vpop.f32.mrf.mxu0 }
 0x4b6   : > { %v1620_v63 = vsel %vm985_vm4, %v1608_v60, -inf  ;;  %v1623_v8 = vsel %vm985_vm4, %v1609_v0, -inf }
 0x4b7   : > { %v2948_v2 = vpop.f32.mrf.mxu1  ;;  %1621 = vmax.xlane.f32.xlu0 %v1620_v63  ;;  %v2954_v3 = vpop.f32.mrf.mxu0 }
 0x4b9   : > { %v1445_v4 = vpop.f32.mrf.mxu1  ;;  %v1494_v5 = vpop.f32.mrf.mxu0 }
 0x4ba   : > { %v1602_v6 = vmul.f32 0.35355338, %v1445_v4  ;;  %v1603_v7 = vmul.f32 0.35355338, %v1494_v5 }
 0x4bb   : > { %v2959_v11 = vpop.f32.mrf.mxu1  ;;  %1624 = vmax.xlane.f32.xlu0 %v1623_v8  ;;  %v2965_v14 = vpop.f32.mrf.mxu0 }
 0x4bc   : > { %v1610_v15 = vadd.f32 %v1602_v6, %v924_v38  ;;  %v3579_v16 = vadd.f32 %v1603_v7, %v924_v38 }
 0x4bd   : > { %v1448_v18 = vpop.f32.mrf.mxu1  ;;  %v1497_v21 = vpop.f32.mrf.mxu0 }
 0x4be   : > { %v1626_v22 = vsel %vm985_vm4, %v1610_v15, -inf  ;;  %v1629_v23 = vsel %vm985_vm4, %v3579_v16, -inf }
 0x4bf   : > { %v2960_v24 = vpop.f32.mrf.mxu1  ;;  %1627 = vmax.xlane.f32.xlu1 %v1626_v22  ;;  %1630 = vmax.xlane.f32.xlu0 %v1629_v23  ;;  %v2966_v25 = vpop.f32.mrf.mxu0 }
 0x4c1   : > { %v1543_v26 = vpop.f32.mrf.mxu1  ;;  %v1592_v27 = vpop.f32.mrf.mxu0 }
 0x4c2   : > { %v1604_v28 = vmul.f32 0.35355338, %v1543_v26  ;;  %v1605_v29 = vmul.f32 0.35355338, %v1592_v27 }
 0x4c3   : > { %v2971_v30 = vpop.f32.mrf.mxu1  ;;  %v2977_v31 = vpop.f32.mrf.mxu0 }
 0x4c4   : > { %v1612_v32 = vadd.f32 %v1604_v28, %v924_v38  ;;  %v3584_v33 = vadd.f32 %v1605_v29, %v924_v38 }
 0x4c5   : > { %v1546_v34 = vpop.f32.mrf.mxu1  ;;  %v1595_v35 = vpop.f32.mrf.mxu0 }
 0x4c6   : > { %v1632_v36 = vsel %vm985_vm4, %v1612_v32, -inf  ;;  %v1635_v37 = vsel %vm985_vm4, %v3584_v33, -inf }
 0x4c7   : > { %v2972_v39 = vpop.f32.mrf.mxu1  ;;  %1633 = vmax.xlane.f32.xlu1 %v1632_v36  ;;  %1636 = vmax.xlane.f32.xlu0 %v1635_v37  ;;  %v2978_v40 = vpop.f32.mrf.mxu0 }
 0x4d1   : > { %v1616_v43 = vpop.xlane.xlu1 %1615 }
 0x4d2   : > { %v1638_v44 = vsub.f32 %v3572_v41, %v1616_v43 }
 0x4d4   : > { %v1646_v46 = vmul.f32 1.442695, %v1638_v44 }
 0x4d8   : > { %1806 = vrot.lane.b32.xlu1 %v3503_v10, %s3225_s23 }
 0x4d9   : > { %v1619_v38 = vpop.xlane.xlu0 %1618 }
 0x4da   : > { %v1639_v42 = vsub.f32 %v1607_v48, %v1619_v38 }
 0x4dc   : > { %1854 = vrot.lane.b32.xlu1 %v3501_v9, %s3225_s23  ;;  %v1648_v45 = vmul.f32 1.442695, %v1639_v42 }
 0x4dd   : > { %1758 = vrot.lane.b32.xlu0 %v3498_v1, %s3225_s23 }
 0x4de   : > { %3157 = vpow2.f32 %v1648_v45 }
 0x4df   : > { %3159 = vpow2.f32 %v1646_v46 }
 0x4eb   : > { %v3158_v47 = vpop.eup %3157 }
 0x4ec   : > { %v1665_v49 = vsel %vm985_vm4, %v3158_v47, 0.0  ;;  %v3597_v50 = vpop.eup %3159 }
 0x4ed   : > { %v1662_v9 = vsel %vm985_vm4, %v3597_v50, 0.0 }
 0x4fc   : > { %1666 = vadd.xlane.f32.xlu0 %v1665_v49 }
 0x500   : > { %1663 = vadd.xlane.f32.xlu1 %v1662_v9 }
 0x511   : > { %1902 = vrot.lane.b32.xlu1 %v3509_v13, %s3225_s23 }
 0x540   : > { %v1622_v1 = vpop.xlane.xlu0 %1621 }
 0x541   : > { %v1640_v10 = vsub.f32 %v1608_v60, %v1622_v1 }
 0x543   : > { %v1650_v41 = vmul.f32 1.442695, %v1640_v10 }
 0x544   : > { %v1625_v48 = vpop.xlane.xlu0 %1624 }
 0x545   : > { %3161 = vpow2.f32 %v1650_v41  ;;  %v1641_v51 = vsub.f32 %v1609_v0, %v1625_v48 }
 0x547   : > { %v1652_v52 = vmul.f32 1.442695, %v1641_v51 }
 0x548   : > { %v1628_v53 = vpop.xlane.xlu1 %1627  ;;  %v1631_v58 = vpop.xlane.xlu0 %1630 }
 0x549   : > { %3163 = vpow2.f32 %v1652_v52  ;;  %v1642_v56 = vsub.f32 %v1610_v15, %v1628_v53  ;;  %v1643_v11 = vsub.f32 %v3579_v16, %v1631_v58 }
 0x54b   : > { %v1654_v57 = vmul.f32 1.442695, %v1642_v56  ;;  %v1656_v14 = vmul.f32 1.442695, %v1643_v11 }
 0x54d   : > { %3165 = vpow2.f32 %v1654_v57 }
 0x550   : > { %v1634_v59 = vpop.xlane.xlu1 %1633  ;;  %v1637_v61 = vpop.xlane.xlu0 %1636 }
 0x551   : > { %v1644_v62 = vsub.f32 %v1612_v32, %v1634_v59  ;;  %v1645_v15 = vsub.f32 %v3584_v33, %v1637_v61 }
 0x552   : > { %v3603_v63 = vpop.eup %3161 }
 0x553   : > { %v1658_v2 = vmul.f32 1.442695, %v1644_v62  ;;  %v1668_v13 = vsel %vm985_vm4, %v3603_v63, 0.0  ;;  %v1660_v18 = vmul.f32 1.442695, %v1645_v15 }
 0x554   : > { %1669 = vadd.xlane.f32.xlu1 %v1668_v13  ;;  %v1759_v60 = vpop.permute.xlu0 %1758  ;;  %v1807_v21 = vpop.permute.xlu1 %1806 }
 0x555   : > { %3167 = vpow2.f32 %v1658_v2  ;;  %v1764_v0 = vsel %vm989_vm2, %v1759_v60, 0  ;;  %v1812_v33 = vsel %vm989_vm2, %v1807_v21, 0 }
 0x556   : > { %v3608_v3 = vpop.eup %3163  ;;  %2986 = vmatpush3.bf16.msra.mxu0 %v1764_v0  ;;  %3169 = vpow2.f32 %v1656_v14 }
 0x557   : > { %v1671_v4 = vsel %vm985_vm4, %v3608_v3, 0.0  ;;  %2997 = vmatprep.subr.bf16.mxu0 %v3219_v17  ;;  %3171 = vpow2.f32 %v1660_v18 }
 0x558   : > { %1672 = vadd.xlane.f32.xlu0 %v1671_v4  ;;  %v1855_v22 = vpop.permute.xlu1 %1854 }
 0x559   : > { %v1860_v30 = vsel %vm989_vm2, %v1855_v22, 0 }
 0x55a   : > { %v3613_v5 = vpop.eup %3165 }
 0x55b   : > { %v1674_v6 = vsel %vm985_vm4, %v3613_v5, 0.0 }
 0x55c   : > { %1675 = vadd.xlane.f32.xlu1 %v1674_v6 }
 0x562   : > { %v3617_v7 = vpop.eup %3167 }
 0x563   : > { %v1680_v8 = vsel %vm985_vm4, %v3617_v7, 0.0  ;;  %v3627_v24 = vpop.eup %3169 }
 0x564   : > { %1681 = vadd.xlane.f32.xlu1 %v1680_v8  ;;  %v3631_v16 = vpop.eup %3171 }
 0x56e   : > { %1950 = vrot.lane.b32.xlu0 %v3507_v12, %s3225_s23  ;;  %v1677_v12 = vsel %vm985_vm4, %v3627_v24, 0.0 }
 0x575   : > { %1998 = vrot.lane.b32.xlu1 %v3516_v20, %s3225_s23  ;;  %v1683_v20 = vsel %vm985_vm4, %v3631_v16, 0.0 }
 0x585   : > { %v1667_v23 = vpop.xlane.xlu0 %1666 }
 0x586   : > { %3173 = vrcp.f32 %v1667_v23 }
 0x589   : > { %v1664_v25 = vpop.xlane.xlu1 %1663 }
 0x58a   : > { %3175 = vrcp.f32 %v1664_v25 }
 0x58d   : > { %1678 = vadd.xlane.f32.xlu0 %v1677_v12  ;;  %v1903_v34 = vpop.permute.xlu1 %1902 }
 0x58e   : > { %v1908_v44 = vsel %vm989_vm2, %v1903_v34, 0 }
 0x591   : > { %1684 = vadd.xlane.f32.xlu0 %v1683_v20 }
 0x593   : > { %v3174_v26 = vpop.eup %3173 }
 0x594   : > { %v1689_v27 = vmul.f32 %v3174_v26, %v3158_v47 }
 0x596   : > { %v1703_v28 = vpack.c.bf16 %v1689_v27, %v1689_v27 }
 0x597   : > { %v3176_v29 = vpop.eup %3175 }
 0x598   : > { %2988 = vmatmul.mubr.msk.bf16.vlgmr.msra.gmra.mxu0 %vm985_vm4, %v1703_v28  ;;  %v1687_v31 = vmul.f32 %v3176_v29, %v3597_v50 }
 0x599   : > { %2998 = vmatpush3.bf16.msra.mxu0 %v1860_v30  ;;  %2999 = vmatprep.mubr.msk.bf16.mxu0 %vm3220_vm3, %v3219_v17  ;;  %v3141_v30 = vld [vmem:[%s3396_s3 + $0x8] sm:$0xff]  }
 0x59a   : > { %v1702_v32 = vpack.c.bf16 %v1687_v31, %v1687_v31  ;;  %3009 = vmatprep.subr.bf16.mxu0 %v3219_v17  ;;  %v3142_v31 = vld [vmem:[%s3396_s3] sm:$0xff]  }
 0x59c   : > { %2982 = vmatmul.mubr.msk.bf16.vlgmr.msra.gmra.mxu1 %vm985_vm4, %v1702_v32 }
 0x59d   : > { %2992 = vmatpush3.bf16.msra.mxu1 %v1812_v33  ;;  %2993 = vmatprep.mubr.msk.bf16.mxu1 %vm3220_vm3, %v3219_v17 }
 0x59e   : > { %3003 = vmatprep.subr.bf16.mxu1 %v3219_v17 }
 0x5a7   : > { %2046 = vrot.lane.b32.xlu0 %v3514_v19, %s3225_s23 }
 0x5dd   : > { %v1670_v35 = vpop.xlane.xlu1 %1669 }
 0x5de   : > { %3177 = vrcp.f32 %v1670_v35 }
 0x5e1   : > { %v1673_v36 = vpop.xlane.xlu0 %1672 }
 0x5e2   : > { %3179 = vrcp.f32 %v1673_v36 }
 0x5e5   : > { %v1676_v37 = vpop.xlane.xlu1 %1675  ;;  %v1951_v45 = vpop.permute.xlu0 %1950 }
 0x5e6   : > { %3181 = vrcp.f32 %v1676_v37  ;;  %v1956_v49 = vsel %vm989_vm2, %v1951_v45, 0 }
 0x5eb   : > { %v3178_v39 = vpop.eup %3177 }
 0x5ec   : > { %v1691_v40 = vmul.f32 %v3178_v39, %v3603_v63 }
 0x5ed   : > { %v1682_v38 = vpop.xlane.xlu1 %1681 }
 0x5ee   : > { %3183 = vrcp.f32 %v1682_v38  ;;  %v1704_v42 = vpack.c.bf16 %v1691_v40, %v1691_v40 }
 0x5ef   : > { %v3180_v43 = vpop.eup %3179 }
 0x5f0   : > { %2994 = vmatmul.mubr.msk.bf16.vlgmr.msra.gmra.mxu1 %vm985_vm4, %v1704_v42  ;;  %v1693_v19 = vmul.f32 %v3180_v43, %v3608_v3 }
 0x5f1   : > { %3004 = vmatpush3.bf16.msra.mxu1 %v1908_v44  ;;  %3005 = vmatprep.mubr.msk.bf16.mxu1 %vm3220_vm3, %v3219_v17  ;;  %v1999_v9 = vpop.permute.xlu1 %1998 }
 0x5f2   : > { %v1705_v46 = vpack.c.bf16 %v1693_v19, %v1693_v19  ;;  %3015 = vmatprep.subr.bf16.mxu1 %v3219_v17  ;;  %v2004_v10 = vsel %vm989_vm2, %v1999_v9, 0 }
 0x5f3   : > { %v3182_v47 = vpop.eup %3181 }
 0x5f4   : > { %3000 = vmatmul.mubr.msk.bf16.vlgmr.msra.gmra.mxu0 %vm985_vm4, %v1705_v46  ;;  %v1695_v50 = vmul.f32 %v3182_v47, %v3613_v5 }
 0x5f5   : > { %3010 = vmatpush3.bf16.msra.mxu0 %v1956_v49  ;;  %3011 = vmatprep.mubr.msk.bf16.mxu0 %vm3220_vm3, %v3219_v17 }
 0x5f6   : > { %v1706_v1 = vpack.c.bf16 %v1695_v50, %v1695_v50  ;;  %3021 = vmatprep.subr.bf16.mxu0 %v3219_v17 }
 0x5f8   : > { %3006 = vmatmul.mubr.msk.bf16.vlgmr.msra.gmra.mxu1 %vm985_vm4, %v1706_v1 }
 0x5f9   : > { %3016 = vmatpush3.bf16.msra.mxu1 %v2004_v10  ;;  %3017 = vmatprep.mubr.msk.bf16.mxu1 %vm3220_vm3, %v3219_v17 }
 0x5fa   : > { %3027 = vmatprep.subr.bf16.mxu1 %v3219_v17 }
 0x5fb   : > { %v3184_v41 = vpop.eup %3183 }
 0x5fc   : > { %v1699_v48 = vmul.f32 %v3184_v41, %v3617_v7 }
 0x5fe   : > { %v1708_v51 = vpack.c.bf16 %v1699_v48, %v1699_v48 }
 0x600   : > { %3018 = vmatmul.mubr.msk.bf16.vlgmr.msra.gmra.mxu1 %vm985_vm4, %v1708_v51 }
 0x601   : > { %3031 = vmatprep.mubr.msk.bf16.mxu1 %vm3220_vm3, %v3219_v17  ;;  %3028 = vmatpush3.bf16.msra.mxu1 %v3141_v30 }
 0x602   : > { %3029 = vmatprep.subr.bf16.mxu1 %v3219_v17 }
 0x605   : > { %3030 = vmatpush3.bf16.msra.mxu1 %v3142_v31  ;;  %v2812_v31 = vld [vmem:[%s884_s26] ss:$0 sm:$0xff] }
 0x606   : > { %3043 = vmatprep.subr.bf16.mxu1 %v3219_v17 }
 0x616   : > { %v1679_v52 = vpop.xlane.xlu0 %1678 }
 0x617   : > { %3185 = vrcp.f32 %v1679_v52 }
 0x61a   : > { %v1685_v53 = vpop.xlane.xlu0 %1684 }
 0x61b   : > { %3187 = vrcp.f32 %v1685_v53 }
 0x61e   : > { %v2047_v58 = vpop.permute.xlu0 %2046 }
 0x61f   : > { %v2052_v62 = vsel %vm989_vm2, %v2047_v58, 0 }
 0x624   : > { %v3186_v56 = vpop.eup %3185 }
 0x625   : > { %v1697_v57 = vmul.f32 %v3186_v56, %v3627_v24  ;;  %v2807_v56 = vld [vmem:[%s3838_s10] ss:$0 sm:$0xff] }
 0x627   : > { %v1707_v59 = vpack.c.bf16 %v1697_v57, %v1697_v57 }
 0x628   : > { %v3188_v61 = vpop.eup %3187 }
 0x629   : > { %3012 = vmatmul.mubr.msk.bf16.vlgmr.msra.gmra.mxu0 %vm985_vm4, %v1707_v59  ;;  %v1701_v63 = vmul.f32 %v3188_v61, %v3631_v16 }
 0x62a   : > { %3022 = vmatpush3.bf16.msra.mxu0 %v2052_v62  ;;  %3023 = vmatprep.mubr.msk.bf16.mxu0 %vm3220_vm3, %v3219_v17 }
 0x62b   : > { %3035 = vmatprep.subr.bf16.mxu0 %v3219_v17  ;;  %v1709_v2 = vpack.c.bf16 %v1701_v63, %v1701_v63 }
 0x631   : > { %3024 = vmatmul.mubr.msk.bf16.vlgmr.msra.gmra.mxu0 %vm985_vm4, %v1709_v2 }
 0x632   : > { %3039 = vmatprep.mubr.msk.bf16.mxu0 %vm3220_vm3, %v3219_v17 }
 0x658   : > { %v1800_v13 = vpop.f32.mrf.mxu0 }
 0x65a   : > { %v2989_v60 = vpop.f32.mrf.mxu0 }
 0x65c   : > { %v1752_v0 = vpop.f32.mrf.mxu1  ;;  %v1803_v3 = vpop.f32.mrf.mxu0 }
 0x65e   : > { %v2983_v4 = vpop.f32.mrf.mxu1  ;;  %v2990_v5 = vpop.f32.mrf.mxu0 }
 0x660   : > { %v1755_v6 = vpop.f32.mrf.mxu1 }
 0x662   : > { %v2984_v7 = vpop.f32.mrf.mxu1 }
 0x6b0   : > { %v1848_v8 = vpop.f32.mrf.mxu1 }
 0x6b2   : > { %v2995_v11 = vpop.f32.mrf.mxu1 }
 0x6b4   : > { %v1851_v14 = vpop.f32.mrf.mxu1  ;;  %v1896_v15 = vpop.f32.mrf.mxu0 }
 0x6b5   : > { %v3122_v18 = vpack.i.bf16 %v1896_v15, %v1848_v8  ;;  %v3143_v15 = vld [vmem:[%s3413_s29 + $0x8] sm:$0xff]  }
 0x6b6   : > { %v2996_v21 = vpop.f32.mrf.mxu1  ;;  %v3001_v22 = vpop.f32.mrf.mxu0  ;;  %3036 = vmatpush3.bf16.msra.mxu0 %v3143_v15 }
 0x6b7   : > { %3123 = vrot.lane.b32.xlu1 %v3122_v18, %s3226_s4  ;;  %v3144_v18 = vld [vmem:[%s3413_s29] sm:$0xff]   ;;  %3037 = vmatprep.subr.bf16.mxu0 %v3219_v17  ;;  %v3145_v21 = vld [vmem:[%s3423_s21 + $0x38] sm:$0xff]   ;;  %v3146_v22 = vld [vmem:[%s3423_s21 + $0x30] sm:$0xff]  }
 0x6b8   : > { %v1899_v23 = vpop.f32.mrf.mxu0  ;;  %v1944_v24 = vpop.f32.mrf.mxu1 }
 0x6b9   : > { %v3147_v23 = vld [vmem:[%s3423_s21 + $0x28] sm:$0xff]  }
 0x6ba   : > { %v3002_v25 = vpop.f32.mrf.mxu0  ;;  %v3007_v12 = vpop.f32.mrf.mxu1  ;;  %3038 = vmatpush3.bf16.msra.mxu0 %v3144_v18 }
 0x6bb   : > { %v3149_v25 = vld [vmem:[%s3423_s21 + $0x18] sm:$0xff]  }
 0x6bc   : > { %v1947_v16 = vpop.f32.mrf.mxu1 }
 0x6be   : > { %v3008_v20 = vpop.f32.mrf.mxu1 }
 0x6c0   : > { %v2040_v26 = vpop.f32.mrf.mxu1 }
 0x6c2   : > { %v3019_v27 = vpop.f32.mrf.mxu1 }
 0x6c4   : > { %v2043_v28 = vpop.f32.mrf.mxu1 }
 0x6c6   : > { %v3020_v29 = vpop.f32.mrf.mxu1 }
 0x6e9   : > { %v1992_v32 = vpop.f32.mrf.mxu0 }
 0x6ea   : > { %v3127_v33 = vpack.i.bf16 %v1992_v32, %v1944_v24  ;;  %v3148_v24 = vld [vmem:[%s3423_s21 + $0x20] sm:$0xff]  }
 0x6eb   : > { %v3013_v34 = vpop.f32.mrf.mxu0 }
 0x6ec   : > { %3128 = vrot.lane.b32.xlu0 %v3127_v33, %s3227_s0  ;;  %s3840_s0 = sld [smem:[#allocation17_spill]] (!%p2829_p6) }
 0x6ed   : > { %v1995_v35 = vpop.f32.mrf.mxu0 }
 0x6ee   : > { %v2813_v35 = vld [vmem:[%s887_s6] ss:$0 sm:$0xff] }
 0x6ef   : > { %v3014_v36 = vpop.f32.mrf.mxu0 }
 0x6f1   : > { %v2088_v37 = vpop.f32.mrf.mxu0 }
 0x6f2   : > { %v3132_v39 = vpack.i.bf16 %v2088_v37, %v2040_v26 }
 0x6f3   : > { %v3025_v40 = vpop.f32.mrf.mxu0 }
 0x6f4   : > { %3133 = vrot.lane.b32.xlu1 %v3132_v39, %s3228_s30 }
 0x6f5   : > { %v2091_v38 = vpop.f32.mrf.mxu0 }
 0x6f6   : > { %v3150_v38 = vld [vmem:[%s3423_s21 + $0x10] sm:$0xff]  }
 0x6f7   : > { %v3026_v42 = vpop.f32.mrf.mxu0 }
 0x6f8   : > { %v3151_v42 = vld [vmem:[%s3423_s21 + $0x8] sm:$0xff]  }
 0x729   : > { %v3124_v43 = vpop.permute.xlu1 %3123 }
 0x72a   : > { %v3126_v19 = vunpack.i.h.bf16 %v3124_v43  ;;  %v3125_v45 = vunpack.i.l.bf16 %v3124_v43  ;;  %v3152_v43 = vld [vmem:[%s3423_s21] sm:$0xff]   ;;  %s3839_s21 = sld [smem:[#allocation16_spill]] (!%p2829_p6) }
 0x72c   : > { %v2119_v50 = vsel %vm985_vm4, %v1800_v13, %v3126_v19  ;;  %v2118_v9 = vsel %vm985_vm4, %v1752_v0, %v3125_v45 }
 0x75e   : > { %v3129_v44 = vpop.permute.xlu0 %3128 }
 0x75f   : > { %v3131_v46 = vunpack.i.h.bf16 %v3129_v44  ;;  %v3130_v47 = vunpack.i.l.bf16 %v3129_v44  ;;  %v2814_v44 = vld [vmem:[%s895_s24] ss:$0 sm:$0xff] }
 0x761   : > { %v2122_v41 = vsel %vm2120_vm5, %v2119_v50, %v3131_v46  ;;  %v2121_v48 = vsel %vm2120_vm5, %v2118_v9, %v3130_v47 }
 0x766   : > { %v3134_v49 = vpop.permute.xlu1 %3133 }
 0x767   : > { %v3136_v1 = vunpack.i.h.bf16 %v3134_v49  ;;  %v3135_v10 = vunpack.i.l.bf16 %v3134_v49 }
 0x769   : > { %v2125_v51 = vsel %vm2123_vm6, %v2122_v41, %v3136_v1  ;;  %v2124_v52 = vsel %vm2123_vm6, %v2121_v48, %v3135_v10 }
 0x76a   : > { %v2847_v53 = vpack.c.bf16 %v2125_v51, %v2124_v52 }
 0x76c   : > { %3032 = vmatmul.mubr.msk.bf16.vlgmr.msra.gmra.mxu1 %vm927_vm1, %v2847_v53 }
 0x76d   : > { %3059 = vmatprep.mubr.msk.bf16.mxu1 %vm3220_vm3, %v3219_v17  ;;  %3044 = vmatpush3.bf16.msra.mxu1 %v3145_v21 }
 0x76e   : > { %3045 = vmatprep.subr.bf16.mxu1 %v3219_v17 }
 0x771   : > { %3046 = vmatpush3.bf16.msra.mxu1 %v3146_v22 }
 0x772   : > { %3047 = vmatprep.subr.bf16.mxu1 %v3219_v17 }
 0x775   : > { %3048 = vmatpush3.bf16.msra.mxu1 %v3147_v23 }
 0x776   : > { %3049 = vmatprep.subr.bf16.mxu1 %v3219_v17 }
 0x779   : > { %3050 = vmatpush3.bf16.msra.mxu1 %v3148_v24 }
 0x77a   : > { %3051 = vmatprep.subr.bf16.mxu1 %v3219_v17 }
 0x77d   : > { %3052 = vmatpush3.bf16.msra.mxu1 %v3149_v25 }
 0x77e   : > { %3053 = vmatprep.subr.bf16.mxu1 %v3219_v17 }
 0x781   : > { %3054 = vmatpush3.bf16.msra.mxu1 %v3150_v38 }
 0x782   : > { %3055 = vmatprep.subr.bf16.mxu1 %v3219_v17 }
 0x785   : > { %3056 = vmatpush3.bf16.msra.mxu1 %v3151_v42 }
 0x786   : > { %3057 = vmatprep.subr.bf16.mxu1 %v3219_v17  ;;  %v2819_v17 = vld [vmem:[%s903_s27] ss:$0 sm:$0xff] }
 0x789   : > { %3058 = vmatpush3.bf16.msra.mxu1 %v3152_v43 }
 0x82c   : > { %v2193_v57 = vpop.f32.mrf.mxu1 }
 0x82d   : > { %v2194_v58 = vadd.f32 %v2807_v56, %v2193_v57 }
 0x82e   : > { %v3033_v59 = vpop.f32.mrf.mxu1 }
 0x82f   : > { %v3695_v61 = vadd.f32 %v2194_v58, %v3484_v54 }
 0x830   : > { %v2196_v62 = vpop.f32.mrf.mxu1 }
 0x831   : > { %v2197_v63 = vadd.f32 %v2807_v56, %v2196_v62  ;;  %v2204_v2 = vsel %vm927_vm1, %v3695_v61, 0.0 }
 0x832   : > { %2205 = vadd.xlane.f32.xlu0 %v2204_v2  ;;  %v3034_v13 = vpop.f32.mrf.mxu1 }
 0x833   : > { %v3700_v60 = vadd.f32 %v2197_v63, %v3486_v55 }
 0x835   : > { %v2207_v0 = vsel %vm927_vm1, %v3700_v60, 0.0 }
 0x836   : > { %2208 = vadd.xlane.f32.xlu1 %v2207_v0 }
 0x8bb   : > { %v2206_v3 = vpop.xlane.xlu0 %2205 }
 0x8bc   : > { %v2210_v4 = vmul.f32 0.03125, %v2206_v3 }
 0x8be   : > { %v2212_v54 = vsub.f32 %v3695_v61, %v2210_v4 }
 0x8bf   : > { %v2209_v5 = vpop.xlane.xlu1 %2208 }
 0x8c0   : > { %v2211_v6 = vmul.f32 0.03125, %v2209_v5  ;;  %v2214_v7 = vmul.f32 %v2212_v54, %v2212_v54 }
 0x8c2   : > { %v2213_v8 = vsub.f32 %v3700_v60, %v2211_v6  ;;  %v2216_v55 = vsel %vm927_vm1, %v2214_v7, 0.0 }
 0x8c3   : > { %2217 = vadd.xlane.f32.xlu0 %v2216_v55 }
 0x8c4   : > { %v2215_v11 = vmul.f32 %v2213_v8, %v2213_v8 }
 0x8c6   : > { %v2219_v14 = vsel %vm927_vm1, %v2215_v11, 0.0 }
 0x8c7   : > { %2220 = vadd.xlane.f32.xlu0 %v2219_v14 }
 0x94c   : > { %v2218_v12 = vpop.xlane.xlu0 %2217 }
 0x94d   : > { %v2222_v16 = vmul.f32 0.03125, %v2218_v12 }
 0x94f   : > { %v2224_v20 = vadd.f32 1e-05, %v2222_v16 }
 0x950   : > { %v2221_v26 = vpop.xlane.xlu0 %2220 }
 0x951   : > { %3189 = vrsqrt.f32 %v2224_v20  ;;  %v2223_v27 = vmul.f32 0.03125, %v2221_v26 }
 0x953   : > { %v2225_v28 = vadd.f32 1e-05, %v2223_v27 }
 0x955   : > { %3191 = vrsqrt.f32 %v2225_v28 }
 0x95e   : > { %v3190_v29 = vpop.eup %3189 }
 0x95f   : > { %v2228_v30 = vmul.f32 %v3190_v29, %v2212_v54 }
 0x961   : > { %v2236_v34 = vmul.f32 %v2812_v31, %v2228_v30 }
 0x962   : > { %v3192_v32 = vpop.eup %3191 }
 0x963   : > { %v2229_v33 = vmul.f32 %v3192_v32, %v2213_v8  ;;  %v2244_v37 = vadd.f32 %v2813_v35, %v2236_v34 }
 0x965   : > { %v2237_v36 = vmul.f32 %v2812_v31, %v2229_v33 }
 0x967   : > { %v2245_v39 = vadd.f32 %v2813_v35, %v2237_v36 }
 0x969   : > { %v2848_v40 = vpack.c.bf16 %v2245_v39, %v2244_v37 }
 0x96b   : > { %3040 = vmatmul.mubr.msk.bf16.vlgmr.msra.gmra.mxu0 %vm927_vm1, %v2848_v40 }
 0xa2b   : > { %v2313_v19 = vpop.f32.mrf.mxu0 }
 0xa2c   : > { %v2314_v46 = vadd.f32 %v2814_v44, %v2313_v19 }
 0xa2d   : > { %v3041_v45 = vpop.f32.mrf.mxu0 }
 0xa2e   : > { %v2320_v9 = vmax.f32 %v2314_v46, 0.0 }
 0xa2f   : > { %v2316_v47 = vpop.f32.mrf.mxu0 }
 0xa30   : > { %v2317_v49 = vadd.f32 %v2814_v44, %v2316_v47 }
 0xa31   : > { %v3042_v50 = vpop.f32.mrf.mxu0 }
 0xa32   : > { %v2321_v1 = vmax.f32 %v2317_v49, 0.0 }
 0xa34   : > { %v2849_v10 = vpack.c.bf16 %v2321_v1, %v2320_v9 }
 0xa36   : > { %3060 = vmatmul.mubr.bf16.vlgmr.msra.gmra.mxu1 %v2849_v10 }
 0xaf6   : > { %v2435_v41 = vpop.f32.mrf.mxu1 }
 0xaf7   : > { %v2436_v48 = vadd.f32 %v2819_v17, %v2435_v41 }
 0xaf8   : > { %v3061_v51 = vpop.f32.mrf.mxu1 }
 0xaf9   : > { %v2442_v52 = vadd.f32 %v2436_v48, %v3695_v61 }
 0xafa   : > { %v2438_v53 = vpop.f32.mrf.mxu1 }
 0xafb   : > { %2444 = vst.msk [vmem:[#allocation2] sm:$0xff] %vm927_vm1, %v2442_v52  ;;  %v2439_v56 = vadd.f32 %v2819_v17, %v2438_v53  ;;  %2449 = sbr.rel (%p2829_p6) target bundleno = 3025 (0xbd1), region = 108 }
 0xafc   : > { %v3062_v57 = vpop.f32.mrf.mxu1 }
 0xafd   : > { %v2443_v58 = vadd.f32 %v2439_v56, %v3700_v60 }
 0xaff   : > { %2445 = vst.msk [vmem:[#allocation2 + $0x8] sm:$0xff] %vm927_vm1, %v2443_v58 }
 0xb00   : > { %v3193_v59 = vld [vmem:[%s3839_s21 + $0x8] sm:$0xff]   ;;  %v3229_v62 = vmov 0.0   ;;  %v3194_v61 = vld [vmem:[%s3839_s21] sm:$0xff]   ;;  %vm3230_vm7 = vmmov 0   ;;  %v2850_v63 = vpack.c.bf16 %v2443_v58, %v2442_v52 }
 0xb01   : > { %3063 = vmatprep.subr.bf16.mxu0 %v3229_v62  ;;  %3067 = vmatprep.mubr.msk.bf16.mxu0 %vm3230_vm7, %v3229_v62  ;;  %v2830_v2 = vld [vmem:[%s3840_s0] ss:$0 sm:$0xff] }
 0xb02   : > { %3064 = vmatpush3.bf16.msra.mxu0 %v3193_v59 }
 0xb03   : > { %3065 = vmatprep.subr.bf16.mxu0 %v3229_v62 }
 0xb06   : > { %3066 = vmatpush3.bf16.msra.mxu0 %v3194_v61 }
 0xb09   : > { %3068 = vmatmul.mubr.msk.bf16.vlgmr.msra.gmra.mxu0 %vm927_vm1, %v2850_v63 }
 0xbc9   : > { %v2517_v13 = vpop.f32.mrf.mxu0 }
 0xbca   : > { %v2518_v60 = vadd.f32 %v2830_v2, %v2517_v13 }
 0xbcb   : > { %v3069_v0 = vpop.f32.mrf.mxu0 }
 0xbcc   : > { %2524 = vst [vmem:[%s3841_s5] sm:$0xff] %v2518_v60 }
 0xbcd   : > { %v2520_v3 = vpop.f32.mrf.mxu0 }
 0xbce   : > { %v2521_v4 = vadd.f32 %v2830_v2, %v2520_v3 }
 0xbcf   : > { %v3070_v54 = vpop.f32.mrf.mxu0 }
 0xbd0   : > { %2525 = vst [vmem:[%s3841_s5 + $0x8] sm:$0xff] %v2521_v4 }
 0xbd1 PF: > { %s3842_s25 = sld [smem:[#allocation4_spill]] }
 0xbd2   : > { %s3843_s1 = sld [smem:[#allocation3_spill]] }
 0xbd3   : > { %s3844_s22 = sld [smem:[#allocation5_spill]] }
 0xbd7   : > { %s30_s23 = sadd.s32 1, %s3842_s25  }
 0xbd8   : > { %p27_p7 = scmp.ge.s32.totalorder %s30_s23, 4  }
 0xbda   :  { %29 = sbr.rel (!%p27_p7) target bundleno = 13 (0xd), region = 186 }

</bundles_post_ra>
